<compile_context>
chip_gen: v7x
topology: tpu7x:2x2x1
jax: 0.10.0
libtpu: 0.0.40
codegen_flags: <defaults>
</compile_context>

<pallas_src>
import functools

import jax
import jax.numpy as jnp
from jax import lax
from jax.experimental import pallas as pl
from jax.experimental.pallas import tpu as pltpu


# -----------------------------------------------------------------------------
# Kernel: one grid step == one chunk of time steps of the skewed 2-layer LSTM.
# Packed recurrent state [h0|h1], [c0|c1] persists in VMEM scratch across the
# sequential chunk axis; inside a chunk it is carried in vregs.
# -----------------------------------------------------------------------------
def _lstm_pinn_kernel(gadd_ref,          # (t_chunk, B, 8H) additive gate terms
                      wbig_ref,          # (2H, 8H) fused recurrent weights
                      h1_out_ref,        # (t_chunk, B, H)  layer-1 hidden out
                      h_sc, c_sc,        # (B, 2H) packed [layer0 | layer1]
                      *, hidden, n_chunks, t_chunk, t_rem, unroll):
    H = hidden
    B = h_sc.shape[0]
    chunk = pl.program_id(0)

    # PyTorch default zero initial state.
    @pl.when(chunk == 0)
    def _():
        h_sc[...] = jnp.zeros_like(h_sc)
        c_sc[...] = jnp.zeros_like(c_sc)

    wbig = wbig_ref[...]
    lane = lax.broadcasted_iota(jnp.int32, (B, 8 * H), 1)
    is_g = (lane >= 4 * H) & (lane < 6 * H)          # [g0|g1] block -> tanh

    def gate_act(z):
        # i/f/o pre-activations were pre-scaled by 0.5:
        #   sigmoid(x) = 0.5 * tanh(x/2) + 0.5      (single EUP push)
        y = jnp.tanh(z)
        return jnp.where(is_g, y, 0.5 * y + 0.5)

    def fused_gates(h_pk, t):
        return gadd_ref[t] + jnp.dot(h_pk, wbig,
                                     preferred_element_type=jnp.float32)

    def run_chunk(n_steps):
        h_pk = h_sc[...]                              # [h0_{t0-1} | h1_{t0-1}]
        c_pk = c_sc[...]

        # ---- prologue: layer 0 only, local time 0 ---------------------------
        act = gate_act(fused_gates(h_pk, 0))
        c0 = act[:, 2*H:3*H] * c_pk[:, :H] + act[:, 0:H] * act[:, 4*H:5*H]
        h0 = act[:, 6*H:7*H] * jnp.tanh(c0)
        h_pk = jnp.concatenate([h0, h_pk[:, H:]], axis=1)   # [h0_{t0} | h1_{t0-1}]
        c_pk = jnp.concatenate([c0, c_pk[:, H:]], axis=1)

        # ---- fused wavefront: layer0 @ time s, layer1 @ time s-1 -------------
        def step(s, carry):
            h, c = carry
            act = gate_act(fused_gates(h, s))
            c = act[:, 2*H:4*H] * c + act[:, 0:2*H] * act[:, 4*H:6*H]
            h = act[:, 6*H:8*H] * jnp.tanh(c)        # = [h0_s | h1_{s-1}]
            h1_out_ref[s - 1] = h[:, H:]
            return h, c

        carry = (h_pk, c_pk)
        n_fused = n_steps - 1
        if n_fused > 0:
            u = min(unroll, n_fused)
            n_blocks, n_tail = divmod(n_fused, u)

            def block(b, cry):
                s0 = 1 + b * u
                for j in range(u):                    # manual partial unroll
                    cry = step(s0 + j, cry)
                return cry

            if n_blocks > 0:
                carry = lax.fori_loop(0, n_blocks, block, carry)
            for j in range(n_tail):
                carry = step(1 + n_blocks * u + j, carry)
        h_pk, c_pk = carry                            # [h0_last | h1_{last-1}]

        # ---- epilogue: layer 1 only, local time n_steps-1 ---------------------
        # (layer-1 bias lives in the odd gate columns of gadd, constant in t)
        act = gate_act(fused_gates(h_pk, 0))
        c1 = act[:, 3*H:4*H] * c_pk[:, H:] + act[:, H:2*H] * act[:, 5*H:6*H]
        h1 = act[:, 7*H:8*H] * jnp.tanh(c1)
        h1_out_ref[n_steps - 1] = h1

        # Persist packed state for the next chunk.
        h_sc[...] = jnp.concatenate([h_pk[:, :H], h1], axis=1)
        c_sc[...] = jnp.concatenate([c_pk[:, :H], c1], axis=1)

    if t_rem == t_chunk:
        run_chunk(t_chunk)
    else:
        @pl.when(chunk < n_chunks - 1)
        def _():
            run_chunk(t_chunk)

        @pl.when(chunk == n_chunks - 1)
        def _():
            run_chunk(t_rem)                          # no wasted padded steps


# -----------------------------------------------------------------------------
# Wrapper: PyTorch-semantics forward  y = fc(lstm(x)),  x: (B, T, D_in).
# -----------------------------------------------------------------------------
def lstm_pinn_forward(x, params, t_chunk=512, unroll=4):
    B, T, _ = x.shape
    H = params["whh0_t"].shape[0]
    unroll = max(1, int(unroll))

    t_chunk = int(min(t_chunk, T))
    n_chunks = -(-T // t_chunk)
    Tp = n_chunks * t_chunk
    t_rem = T - (n_chunks - 1) * t_chunk              # static length of last chunk

    x_tm = jnp.transpose(x, (1, 0, 2)).astype(jnp.float32)          # (T, B, Din)

    # Hoisted lane-dense layer-0 input projection over all time steps.
    g0 = jnp.einsum("tbd,dh->tbh", x_tm, params["wih0_t"]) + params["b0"]

    # Build interleaved, pre-scaled gate layout [i0|i1|f0|f1|g0|g1|o0|o1].
    b1 = params["b1"]                                                # (1, 4H)
    gadd_cols, wbig_cols = [], []
    zero_h = jnp.zeros((H, H), jnp.float32)
    for gi in range(4):                                              # i, f, g, o
        s = 1.0 if gi == 2 else 0.5                                  # halve i/f/o
        sl = slice(gi * H, (gi + 1) * H)
        # additive terms: layer-0 (time-varying x-proj) | layer-1 (bias)
        gadd_cols.append(g0[..., sl] * s)
        gadd_cols.append(jnp.broadcast_to((b1[0, sl] * s)[None, None, :],
                                          (T, B, H)))
        # recurrent weights, rows = [h0 ; h1]
        wbig_cols.append(jnp.concatenate([params["whh0_t"][:, sl] * s,
                                          zero_h], axis=0))
        wbig_cols.append(jnp.concatenate([params["wih1_t"][:, sl] * s,
                                          params["whh1_t"][:, sl] * s], axis=0))
    gadd = jnp.concatenate(gadd_cols, axis=-1)                       # (T, B, 8H)
    w_big = jnp.concatenate(wbig_cols, axis=1)                       # (2H, 8H)

    if Tp != T:
        gadd = jnp.pad(gadd, ((0, Tp - T), (0, 0), (0, 0)))          # never read

    kernel = functools.partial(_lstm_pinn_kernel, hidden=H, n_chunks=n_chunks,
                               t_chunk=t_chunk, t_rem=t_rem, unroll=unroll)

    h1_all = pl.pallas_call(
        kernel,
        out_shape=jax.ShapeDtypeStruct((Tp, B, H), jnp.float32),
        grid_spec=pltpu.PrefetchScalarGridSpec(
            num_scalar_prefetch=0,
            grid=(n_chunks,),
            in_specs=[
                pl.BlockSpec((t_chunk, B, 8 * H), lambda c: (c, 0, 0)),  # gadd
                pl.BlockSpec((2 * H, 8 * H), lambda c: (0, 0)),          # w_big
            ],
            out_specs=pl.BlockSpec((t_chunk, B, H), lambda c: (c, 0, 0)),
            scratch_shapes=[
                pltpu.VMEM((B, 2 * H), jnp.float32),   # packed h = [h0 | h1]
                pltpu.VMEM((B, 2 * H), jnp.float32),   # packed c = [c0 | c1]
            ],
        ),
        compiler_params=pltpu.CompilerParams(
            dimension_semantics=("arbitrary",),        # chunks are sequential
            vmem_limit_bytes=32 * 1024 * 1024),
    )(gadd, w_big)

    h1_all = h1_all[:T]                                              # drop pad

    # Hoisted FC head (Linear -> Tanh -> Linear) as lane-dense batched matmuls.
    z = jnp.tanh(jnp.einsum("tbh,hg->tbg", h1_all, params["wfc1_t"])
                 + params["bfc1"])
    y = jnp.einsum("tbg,go->tbo", z, params["wfc2_t"]) + params["bfc2"]
    return jnp.transpose(y, (1, 0, 2))                               # (B, T, out)


# -----------------------------------------------------------------------------
# Deterministic parameter construction (shapes match nn.LSTM / nn.Linear).
# -----------------------------------------------------------------------------
def init_params(key, in_dim, hidden_dim, out_dim):
    H = hidden_dim
    k = 1.0 / jnp.sqrt(jnp.float32(H))
    keys = jax.random.split(key, 12)

    def u(kk, shape):
        return jax.random.uniform(kk, shape, jnp.float32, -k, k)

    wih0 = u(keys[0], (4 * H, in_dim))
    whh0 = u(keys[1], (4 * H, H))
    b0 = u(keys[2], (4 * H,)) + u(keys[3], (4 * H,))       # bias_ih + bias_hh
    wih1 = u(keys[4], (4 * H, H))
    whh1 = u(keys[5], (4 * H, H))
    b1 = u(keys[6], (4 * H,)) + u(keys[7], (4 * H,))
    wfc1 = u(keys[8], (H, H))
    bfc1 = u(keys[9], (H,))
    wfc2 = u(keys[10], (out_dim, H))
    bfc2 = u(keys[11], (out_dim,))

    return {
        # pre-transposed for row-major (B, in) @ (in, out) matmuls
        "wih0_t": wih0.T, "whh0_t": whh0.T, "b0": b0.reshape(1, 4 * H),
        "wih1_t": wih1.T, "whh1_t": whh1.T, "b1": b1.reshape(1, 4 * H),
        "wfc1_t": wfc1.T, "bfc1": bfc1.reshape(1, H),
        "wfc2_t": wfc2.T, "bfc2": bfc2.reshape(1, out_dim),
    }


# -----------------------------------------------------------------------------
# Pure-JAX reference (PyTorch LSTM semantics) for the correctness check.
# -----------------------------------------------------------------------------
def reference_forward(x, params):
    B, T, _ = x.shape
    H = params["whh0_t"].shape[0]

    def cell(x_in, h, c, wih_t, whh_t, b):
        g = x_in @ wih_t + h @ whh_t + b
        i = jax.nn.sigmoid(g[:, 0 * H:1 * H])
        f = jax.nn.sigmoid(g[:, 1 * H:2 * H])
        gg = jnp.tanh(g[:, 2 * H:3 * H])
        o = jax.nn.sigmoid(g[:, 3 * H:4 * H])
        c = f * c + i * gg
        h = o * jnp.tanh(c)
        return h, c

    h0 = jnp.zeros((B, H), jnp.float32)
    c0 = jnp.zeros((B, H), jnp.float32)
    h1 = jnp.zeros((B, H), jnp.float32)
    c1 = jnp.zeros((B, H), jnp.float32)
    ys = []
    for t in range(T):
        xt = x[:, t, :].astype(jnp.float32)
        h0, c0 = cell(xt, h0, c0, params["wih0_t"], params["whh0_t"], params["b0"])
        h1, c1 = cell(h0, h1, c1, params["wih1_t"], params["whh1_t"], params["b1"])
        z = jnp.tanh(h1 @ params["wfc1_t"] + params["bfc1"])
        ys.append(z @ params["wfc2_t"] + params["bfc2"])
    return jnp.stack(ys, axis=1)


if __name__ == "__main__":
    # Small shapes consistent with the module forward: (B, T, in_dim=3),
    # hidden_dim = module default 64, out_dim = 3.
    B, T, IN_DIM, HIDDEN, OUT_DIM = 2, 8, 3, 64, 3

    key = jax.random.PRNGKey(0)
    k_param, k_x = jax.random.split(key)
    params = init_params(k_param, IN_DIM, HIDDEN, OUT_DIM)
    x = jax.random.normal(k_x, (B, T, IN_DIM), jnp.float32)

    # Single-chunk run (T <= t_chunk).
    y = jax.block_until_ready(lstm_pinn_forward(x, params))
    y_ref = jax.block_until_ready(reference_forward(x, params))
    assert y.shape == (B, T, OUT_DIM), y.shape
    err = float(jnp.max(jnp.abs(y - y_ref)))
    assert err < 1e-4, err

    # Multi-chunk run: exercises cross-chunk state carry, the ragged last
    # chunk (no padded steps executed) and the unrolled recurrence path.
    T2 = 20
    x2 = jax.random.normal(jax.random.PRNGKey(1), (B, T2, IN_DIM), jnp.float32)
    y2 = jax.block_until_ready(lstm_pinn_forward(x2, params, t_chunk=8, unroll=4))
    y2_ref = jax.block_until_ready(reference_forward(x2, params))
    assert y2.shape == (B, T2, OUT_DIM), y2.shape
    err2 = float(jnp.max(jnp.abs(y2 - y2_ref)))
    assert err2 < 1e-4, err2

    print("KERNEL_OK")
</pallas_src>

<mosaic_0001>
module attributes {stable_mosaic.version = 11 : i64} {
  func.func @_lstm_pinn_kernel(%arg0: i32, %arg1: memref<8x2x512xf32, #tpu.memory_space<vmem>>, %arg2: memref<128x512xf32, #tpu.memory_space<vmem>>, %arg3: memref<8x2x64xf32, #tpu.memory_space<vmem>>, %arg4: memref<2x128xf32, #tpu.memory_space<vmem>>, %arg5: memref<2x128xf32, #tpu.memory_space<vmem>>) attributes {dimension_semantics = [#tpu.dimension_semantics<arbitrary>], iteration_bounds = array<i64: 1>, scalar_prefetch = 0 : i64, scratch_operands = 2 : i64, tpu.core_type = #tpu.core_type<tc>, window_params = [{transform_indices = @transform_0, window_bounds = array<i64: 8, 2, 512>}, {pipeline_mode = #tpu.pipeline_mode<synchronous>, transform_indices = @transform_1, window_bounds = array<i64: 128, 512>}, {transform_indices = @transform_2, window_bounds = array<i64: 8, 2, 64>}]} {
    %c0_i32 = arith.constant 0 : i32
    %0 = arith.cmpi eq, %arg0, %c0_i32 : i32
    %1 = arith.extui %0 : i1 to i32
    %c0_i32_0 = arith.constant 0 : i32
    %2 = arith.cmpi ne, %1, %c0_i32_0 : i32
    scf.if %2 {
      %cst_83 = arith.constant 0.000000e+00 : f32
      %244 = vector.broadcast %cst_83 : f32 to vector<2x128xf32>
      %c0_84 = arith.constant 0 : index
      %c0_85 = arith.constant 0 : index
      %245 = vector.load %arg4[%c0_84, %c0_85] : memref<2x128xf32, #tpu.memory_space<vmem>>, vector<2x128xf32>
      tpu.vector_store %arg4[%c0_84, %c0_85], %244 {strides = array<i32>} : memref<2x128xf32, #tpu.memory_space<vmem>>, vector<2x128xf32>,
      %cst_86 = arith.constant 0.000000e+00 : f32
      %246 = vector.broadcast %cst_86 : f32 to vector<2x128xf32>
      %c0_87 = arith.constant 0 : index
      %c0_88 = arith.constant 0 : index
      %247 = vector.load %arg5[%c0_87, %c0_88] : memref<2x128xf32, #tpu.memory_space<vmem>>, vector<2x128xf32>
      tpu.vector_store %arg5[%c0_87, %c0_88], %246 {strides = array<i32>} : memref<2x128xf32, #tpu.memory_space<vmem>>, vector<2x128xf32>,
    } else {
    }
    %c0 = arith.constant 0 : index
    %c0_1 = arith.constant 0 : index
    %3 = vector.load %arg2[%c0, %c0_1] : memref<128x512xf32, #tpu.memory_space<vmem>>, vector<128x512xf32>
    %4 = tpu.iota {dimensions = array<i32: 1>} : vector<2x512xi32>
    %c256_i32 = arith.constant 256 : i32
    %5 = vector.broadcast %c256_i32 : i32 to vector<2x512xi32>
    %6 = arith.cmpi sge, %4, %5 : vector<2x512xi32>
    %c384_i32 = arith.constant 384 : i32
    %7 = vector.broadcast %c384_i32 : i32 to vector<2x512xi32>
    %8 = arith.cmpi slt, %4, %7 : vector<2x512xi32>
    %9 = arith.andi %6, %8 : vector<2x512xi1>
    %c0_2 = arith.constant 0 : index
    %c0_3 = arith.constant 0 : index
    %10 = vector.load %arg4[%c0_2, %c0_3] : memref<2x128xf32, #tpu.memory_space<vmem>>, vector<2x128xf32>
    %c0_4 = arith.constant 0 : index
    %c0_5 = arith.constant 0 : index
    %11 = vector.load %arg5[%c0_4, %c0_5] : memref<2x128xf32, #tpu.memory_space<vmem>>, vector<2x128xf32>
    %c0_6 = arith.constant 0 : index
    %c0_7 = arith.constant 0 : index
    %c0_8 = arith.constant 0 : index
    %12 = vector.load %arg1[%c0_6, %c0_7, %c0_8] : memref<8x2x512xf32, #tpu.memory_space<vmem>>, vector<1x2x512xf32>
    %13 = vector.shape_cast %12 : vector<1x2x512xf32> to vector<2x512xf32>
    %cst = arith.constant dense<0.000000e+00> : vector<2x512xf32>
    %14 = tpu.matmul %10, %3, %cst {dimension_numbers = #tpu.dot_dimension_numbers<[1], [0], [0], [1], [0, 0, 1, 1], [], []>} : vector<2x128xf32>, vector<128x512xf32>, vector<2x512xf32> -> vector<2x512xf32>
    %15 = arith.addf %13, %14 : vector<2x512xf32>
    %16 = math.tanh %15 : vector<2x512xf32>
    %cst_9 = arith.constant 5.000000e-01 : f32
    %17 = vector.broadcast %cst_9 : f32 to vector<2x512xf32>
    %18 = arith.mulf %17, %16 : vector<2x512xf32>
    %cst_10 = arith.constant 5.000000e-01 : f32
    %19 = vector.broadcast %cst_10 : f32 to vector<2x512xf32>
    %20 = arith.addf %18, %19 : vector<2x512xf32>
    %21 = arith.select %9, %16, %20 : vector<2x512xi1>, vector<2x512xf32>
    %22 = vector.extract_strided_slice %21 {offsets = [0, 128], sizes = [2, 64], strides = [1, 1]} : vector<2x512xf32> to vector<2x64xf32>
    %23 = vector.extract_strided_slice %11 {offsets = [0, 0], sizes = [2, 64], strides = [1, 1]} : vector<2x128xf32> to vector<2x64xf32>
    %24 = arith.mulf %22, %23 : vector<2x64xf32>
    %25 = vector.extract_strided_slice %21 {offsets = [0, 0], sizes = [2, 64], strides = [1, 1]} : vector<2x512xf32> to vector<2x64xf32>
    %26 = vector.extract_strided_slice %21 {offsets = [0, 256], sizes = [2, 64], strides = [1, 1]} : vector<2x512xf32> to vector<2x64xf32>
    %27 = arith.mulf %25, %26 : vector<2x64xf32>
    %28 = arith.addf %24, %27 : vector<2x64xf32>
    %29 = vector.extract_strided_slice %21 {offsets = [0, 384], sizes = [2, 64], strides = [1, 1]} : vector<2x512xf32> to vector<2x64xf32>
    %30 = math.tanh %28 : vector<2x64xf32>
    %31 = arith.mulf %29, %30 : vector<2x64xf32>
    %32 = vector.extract_strided_slice %10 {offsets = [0, 64], sizes = [2, 64], strides = [1, 1]} : vector<2x128xf32> to vector<2x64xf32>
    %33 = tpu.concatenate %31, %32 in 1 : vector<2x64xf32>, vector<2x64xf32> -> vector<2x128xf32>
    %34 = vector.extract_strided_slice %11 {offsets = [0, 64], sizes = [2, 64], strides = [1, 1]} : vector<2x128xf32> to vector<2x64xf32>
    %35 = tpu.concatenate %28, %34 in 1 : vector<2x64xf32>, vector<2x64xf32> -> vector<2x128xf32>
    %c0_i32_11 = arith.constant 0 : i32
    %c4_i32 = arith.constant 4 : i32
    %36 = arith.muli %c0_i32_11, %c4_i32 : i32
    %c1_i32 = arith.constant 1 : i32
    %37 = arith.addi %c1_i32, %36 : i32
    %c0_i32_12 = arith.constant 0 : i32
    %38 = arith.addi %37, %c0_i32_12 : i32
    %39 = arith.index_cast %38 : i32 to index
    %c0_13 = arith.constant 0 : index
    %c0_14 = arith.constant 0 : index
    %40 = vector.load %arg1[%39, %c0_13, %c0_14] : memref<8x2x512xf32, #tpu.memory_space<vmem>>, vector<1x2x512xf32>
    %41 = vector.shape_cast %40 : vector<1x2x512xf32> to vector<2x512xf32>
    %cst_15 = arith.constant dense<0.000000e+00> : vector<2x512xf32>
    %42 = tpu.matmul %33, %3, %cst_15 {dimension_numbers = #tpu.dot_dimension_numbers<[1], [0], [0], [1], [0, 0, 1, 1], [], []>} : vector<2x128xf32>, vector<128x512xf32>, vector<2x512xf32> -> vector<2x512xf32>
    %43 = arith.addf %41, %42 : vector<2x512xf32>
    %44 = math.tanh %43 : vector<2x512xf32>
    %cst_16 = arith.constant 5.000000e-01 : f32
    %45 = vector.broadcast %cst_16 : f32 to vector<2x512xf32>
    %46 = arith.mulf %45, %44 : vector<2x512xf32>
    %cst_17 = arith.constant 5.000000e-01 : f32
    %47 = vector.broadcast %cst_17 : f32 to vector<2x512xf32>
    %48 = arith.addf %46, %47 : vector<2x512xf32>
    %49 = arith.select %9, %44, %48 : vector<2x512xi1>, vector<2x512xf32>
    %50 = vector.extract_strided_slice %49 {offsets = [0, 128], sizes = [2, 128], strides = [1, 1]} : vector<2x512xf32> to vector<2x128xf32>
    %51 = arith.mulf %50, %35 : vector<2x128xf32>
    %52 = vector.extract_strided_slice %49 {offsets = [0, 0], sizes = [2, 128], strides = [1, 1]} : vector<2x512xf32> to vector<2x128xf32>
    %53 = vector.extract_strided_slice %49 {offsets = [0, 256], sizes = [2, 128], strides = [1, 1]} : vector<2x512xf32> to vector<2x128xf32>
    %54 = arith.mulf %52, %53 : vector<2x128xf32>
    %55 = arith.addf %51, %54 : vector<2x128xf32>
    %56 = vector.extract_strided_slice %49 {offsets = [0, 384], sizes = [2, 128], strides = [1, 1]} : vector<2x512xf32> to vector<2x128xf32>
    %57 = math.tanh %55 : vector<2x128xf32>
    %58 = arith.mulf %56, %57 : vector<2x128xf32>
    %59 = vector.extract_strided_slice %58 {offsets = [0, 64], sizes = [2, 64], strides = [1, 1]} : vector<2x128xf32> to vector<2x64xf32>
    %c1_i32_18 = arith.constant 1 : i32
    %60 = arith.subi %38, %c1_i32_18 : i32
    %61 = arith.index_cast %60 : i32 to index
    %c0_19 = arith.constant 0 : index
    %c0_20 = arith.constant 0 : index
    %62 = vector.load %arg3[%61, %c0_19, %c0_20] : memref<8x2x64xf32, #tpu.memory_space<vmem>>, vector<1x2x64xf32>
    %63 = vector.shape_cast %62 : vector<1x2x64xf32> to vector<2x64xf32>
    %64 = vector.shape_cast %59 : vector<2x64xf32> to vector<1x2x64xf32>
    tpu.vector_store %arg3[%61, %c0_19, %c0_20], %64 {strides = array<i32>} : memref<8x2x64xf32, #tpu.memory_space<vmem>>, vector<1x2x64xf32>,
    %c1_i32_21 = arith.constant 1 : i32
    %65 = arith.addi %37, %c1_i32_21 : i32
    %66 = arith.index_cast %65 : i32 to index
    %c0_22 = arith.constant 0 : index
    %c0_23 = arith.constant 0 : index
    %67 = vector.load %arg1[%66, %c0_22, %c0_23] : memref<8x2x512xf32, #tpu.memory_space<vmem>>, vector<1x2x512xf32>
    %68 = vector.shape_cast %67 : vector<1x2x512xf32> to vector<2x512xf32>
    %cst_24 = arith.constant dense<0.000000e+00> : vector<2x512xf32>
    %69 = tpu.matmul %58, %3, %cst_24 {dimension_numbers = #tpu.dot_dimension_numbers<[1], [0], [0], [1], [0, 0, 1, 1], [], []>} : vector<2x128xf32>, vector<128x512xf32>, vector<2x512xf32> -> vector<2x512xf32>
    %70 = arith.addf %68, %69 : vector<2x512xf32>
    %71 = math.tanh %70 : vector<2x512xf32>
    %cst_25 = arith.constant 5.000000e-01 : f32
    %72 = vector.broadcast %cst_25 : f32 to vector<2x512xf32>
    %73 = arith.mulf %72, %71 : vector<2x512xf32>
    %cst_26 = arith.constant 5.000000e-01 : f32
    %74 = vector.broadcast %cst_26 : f32 to vector<2x512xf32>
    %75 = arith.addf %73, %74 : vector<2x512xf32>
    %76 = arith.select %9, %71, %75 : vector<2x512xi1>, vector<2x512xf32>
    %77 = vector.extract_strided_slice %76 {offsets = [0, 128], sizes = [2, 128], strides = [1, 1]} : vector<2x512xf32> to vector<2x128xf32>
    %78 = arith.mulf %77, %55 : vector<2x128xf32>
    %79 = vector.extract_strided_slice %76 {offsets = [0, 0], sizes = [2, 128], strides = [1, 1]} : vector<2x512xf32> to vector<2x128xf32>
    %80 = vector.extract_strided_slice %76 {offsets = [0, 256], sizes = [2, 128], strides = [1, 1]} : vector<2x512xf32> to vector<2x128xf32>
    %81 = arith.mulf %79, %80 : vector<2x128xf32>
    %82 = arith.addf %78, %81 : vector<2x128xf32>
    %83 = vector.extract_strided_slice %76 {offsets = [0, 384], sizes = [2, 128], strides = [1, 1]} : vector<2x512xf32> to vector<2x128xf32>
    %84 = math.tanh %82 : vector<2x128xf32>
    %85 = arith.mulf %83, %84 : vector<2x128xf32>
    %86 = vector.extract_strided_slice %85 {offsets = [0, 64], sizes = [2, 64], strides = [1, 1]} : vector<2x128xf32> to vector<2x64xf32>
    %c1_i32_27 = arith.constant 1 : i32
    %87 = arith.subi %65, %c1_i32_27 : i32
    %88 = arith.index_cast %87 : i32 to index
    %c0_28 = arith.constant 0 : index
    %c0_29 = arith.constant 0 : index
    %89 = vector.load %arg3[%88, %c0_28, %c0_29] : memref<8x2x64xf32, #tpu.memory_space<vmem>>, vector<1x2x64xf32>
    %90 = vector.shape_cast %89 : vector<1x2x64xf32> to vector<2x64xf32>
    %91 = vector.shape_cast %86 : vector<2x64xf32> to vector<1x2x64xf32>
    tpu.vector_store %arg3[%88, %c0_28, %c0_29], %91 {strides = array<i32>} : memref<8x2x64xf32, #tpu.memory_space<vmem>>, vector<1x2x64xf32>,
    %c2_i32 = arith.constant 2 : i32
    %92 = arith.addi %37, %c2_i32 : i32
    %93 = arith.index_cast %92 : i32 to index
    %c0_30 = arith.constant 0 : index
    %c0_31 = arith.constant 0 : index
    %94 = vector.load %arg1[%93, %c0_30, %c0_31] : memref<8x2x512xf32, #tpu.memory_space<vmem>>, vector<1x2x512xf32>
    %95 = vector.shape_cast %94 : vector<1x2x512xf32> to vector<2x512xf32>
    %cst_32 = arith.constant dense<0.000000e+00> : vector<2x512xf32>
    %96 = tpu.matmul %85, %3, %cst_32 {dimension_numbers = #tpu.dot_dimension_numbers<[1], [0], [0], [1], [0, 0, 1, 1], [], []>} : vector<2x128xf32>, vector<128x512xf32>, vector<2x512xf32> -> vector<2x512xf32>
    %97 = arith.addf %95, %96 : vector<2x512xf32>
    %98 = math.tanh %97 : vector<2x512xf32>
    %cst_33 = arith.constant 5.000000e-01 : f32
    %99 = vector.broadcast %cst_33 : f32 to vector<2x512xf32>
    %100 = arith.mulf %99, %98 : vector<2x512xf32>
    %cst_34 = arith.constant 5.000000e-01 : f32
    %101 = vector.broadcast %cst_34 : f32 to vector<2x512xf32>
    %102 = arith.addf %100, %101 : vector<2x512xf32>
    %103 = arith.select %9, %98, %102 : vector<2x512xi1>, vector<2x512xf32>
    %104 = vector.extract_strided_slice %103 {offsets = [0, 128], sizes = [2, 128], strides = [1, 1]} : vector<2x512xf32> to vector<2x128xf32>
    %105 = arith.mulf %104, %82 : vector<2x128xf32>
    %106 = vector.extract_strided_slice %103 {offsets = [0, 0], sizes = [2, 128], strides = [1, 1]} : vector<2x512xf32> to vector<2x128xf32>
    %107 = vector.extract_strided_slice %103 {offsets = [0, 256], sizes = [2, 128], strides = [1, 1]} : vector<2x512xf32> to vector<2x128xf32>
    %108 = arith.mulf %106, %107 : vector<2x128xf32>
    %109 = arith.addf %105, %108 : vector<2x128xf32>
    %110 = vector.extract_strided_slice %103 {offsets = [0, 384], sizes = [2, 128], strides = [1, 1]} : vector<2x512xf32> to vector<2x128xf32>
    %111 = math.tanh %109 : vector<2x128xf32>
    %112 = arith.mulf %110, %111 : vector<2x128xf32>
    %113 = vector.extract_strided_slice %112 {offsets = [0, 64], sizes = [2, 64], strides = [1, 1]} : vector<2x128xf32> to vector<2x64xf32>
    %c1_i32_35 = arith.constant 1 : i32
    %114 = arith.subi %92, %c1_i32_35 : i32
    %115 = arith.index_cast %114 : i32 to index
    %c0_36 = arith.constant 0 : index
    %c0_37 = arith.constant 0 : index
    %116 = vector.load %arg3[%115, %c0_36, %c0_37] : memref<8x2x64xf32, #tpu.memory_space<vmem>>, vector<1x2x64xf32>
    %117 = vector.shape_cast %116 : vector<1x2x64xf32> to vector<2x64xf32>
    %118 = vector.shape_cast %113 : vector<2x64xf32> to vector<1x2x64xf32>
    tpu.vector_store %arg3[%115, %c0_36, %c0_37], %118 {strides = array<i32>} : memref<8x2x64xf32, #tpu.memory_space<vmem>>, vector<1x2x64xf32>,
    %c3_i32 = arith.constant 3 : i32
    %119 = arith.addi %37, %c3_i32 : i32
    %120 = arith.index_cast %119 : i32 to index
    %c0_38 = arith.constant 0 : index
    %c0_39 = arith.constant 0 : index
    %121 = vector.load %arg1[%120, %c0_38, %c0_39] : memref<8x2x512xf32, #tpu.memory_space<vmem>>, vector<1x2x512xf32>
    %122 = vector.shape_cast %121 : vector<1x2x512xf32> to vector<2x512xf32>
    %cst_40 = arith.constant dense<0.000000e+00> : vector<2x512xf32>
    %123 = tpu.matmul %112, %3, %cst_40 {dimension_numbers = #tpu.dot_dimension_numbers<[1], [0], [0], [1], [0, 0, 1, 1], [], []>} : vector<2x128xf32>, vector<128x512xf32>, vector<2x512xf32> -> vector<2x512xf32>
    %124 = arith.addf %122, %123 : vector<2x512xf32>
    %125 = math.tanh %124 : vector<2x512xf32>
    %cst_41 = arith.constant 5.000000e-01 : f32
    %126 = vector.broadcast %cst_41 : f32 to vector<2x512xf32>
    %127 = arith.mulf %126, %125 : vector<2x512xf32>
    %cst_42 = arith.constant 5.000000e-01 : f32
    %128 = vector.broadcast %cst_42 : f32 to vector<2x512xf32>
    %129 = arith.addf %127, %128 : vector<2x512xf32>
    %130 = arith.select %9, %125, %129 : vector<2x512xi1>, vector<2x512xf32>
    %131 = vector.extract_strided_slice %130 {offsets = [0, 128], sizes = [2, 128], strides = [1, 1]} : vector<2x512xf32> to vector<2x128xf32>
    %132 = arith.mulf %131, %109 : vector<2x128xf32>
    %133 = vector.extract_strided_slice %130 {offsets = [0, 0], sizes = [2, 128], strides = [1, 1]} : vector<2x512xf32> to vector<2x128xf32>
    %134 = vector.extract_strided_slice %130 {offsets = [0, 256], sizes = [2, 128], strides = [1, 1]} : vector<2x512xf32> to vector<2x128xf32>
    %135 = arith.mulf %133, %134 : vector<2x128xf32>
    %136 = arith.addf %132, %135 : vector<2x128xf32>
    %137 = vector.extract_strided_slice %130 {offsets = [0, 384], sizes = [2, 128], strides = [1, 1]} : vector<2x512xf32> to vector<2x128xf32>
    %138 = math.tanh %136 : vector<2x128xf32>
    %139 = arith.mulf %137, %138 : vector<2x128xf32>
    %140 = vector.extract_strided_slice %139 {offsets = [0, 64], sizes = [2, 64], strides = [1, 1]} : vector<2x128xf32> to vector<2x64xf32>
    %c1_i32_43 = arith.constant 1 : i32
    %141 = arith.subi %119, %c1_i32_43 : i32
    %142 = arith.index_cast %141 : i32 to index
    %c0_44 = arith.constant 0 : index
    %c0_45 = arith.constant 0 : index
    %143 = vector.load %arg3[%142, %c0_44, %c0_45] : memref<8x2x64xf32, #tpu.memory_space<vmem>>, vector<1x2x64xf32>
    %144 = vector.shape_cast %143 : vector<1x2x64xf32> to vector<2x64xf32>
    %145 = vector.shape_cast %140 : vector<2x64xf32> to vector<1x2x64xf32>
    tpu.vector_store %arg3[%142, %c0_44, %c0_45], %145 {strides = array<i32>} : memref<8x2x64xf32, #tpu.memory_space<vmem>>, vector<1x2x64xf32>,
    %c1_i32_46 = arith.constant 1 : i32
    %c5 = arith.constant 5 : index
    %c0_47 = arith.constant 0 : index
    %c0_48 = arith.constant 0 : index
    %146 = vector.load %arg1[%c5, %c0_47, %c0_48] : memref<8x2x512xf32, #tpu.memory_space<vmem>>, vector<1x2x512xf32>
    %147 = vector.shape_cast %146 : vector<1x2x512xf32> to vector<2x512xf32>
    %cst_49 = arith.constant dense<0.000000e+00> : vector<2x512xf32>
    %148 = tpu.matmul %139, %3, %cst_49 {dimension_numbers = #tpu.dot_dimension_numbers<[1], [0], [0], [1], [0, 0, 1, 1], [], []>} : vector<2x128xf32>, vector<128x512xf32>, vector<2x512xf32> -> vector<2x512xf32>
    %149 = arith.addf %147, %148 : vector<2x512xf32>
    %150 = math.tanh %149 : vector<2x512xf32>
    %cst_50 = arith.constant 5.000000e-01 : f32
    %151 = vector.broadcast %cst_50 : f32 to vector<2x512xf32>
    %152 = arith.mulf %151, %150 : vector<2x512xf32>
    %cst_51 = arith.constant 5.000000e-01 : f32
    %153 = vector.broadcast %cst_51 : f32 to vector<2x512xf32>
    %154 = arith.addf %152, %153 : vector<2x512xf32>
    %155 = arith.select %9, %150, %154 : vector<2x512xi1>, vector<2x512xf32>
    %156 = vector.extract_strided_slice %155 {offsets = [0, 128], sizes = [2, 128], strides = [1, 1]} : vector<2x512xf32> to vector<2x128xf32>
    %157 = arith.mulf %156, %136 : vector<2x128xf32>
    %158 = vector.extract_strided_slice %155 {offsets = [0, 0], sizes = [2, 128], strides = [1, 1]} : vector<2x512xf32> to vector<2x128xf32>
    %159 = vector.extract_strided_slice %155 {offsets = [0, 256], sizes = [2, 128], strides = [1, 1]} : vector<2x512xf32> to vector<2x128xf32>
    %160 = arith.mulf %158, %159 : vector<2x128xf32>
    %161 = arith.addf %157, %160 : vector<2x128xf32>
    %162 = vector.extract_strided_slice %155 {offsets = [0, 384], sizes = [2, 128], strides = [1, 1]} : vector<2x512xf32> to vector<2x128xf32>
    %163 = math.tanh %161 : vector<2x128xf32>
    %164 = arith.mulf %162, %163 : vector<2x128xf32>
    %165 = vector.extract_strided_slice %164 {offsets = [0, 64], sizes = [2, 64], strides = [1, 1]} : vector<2x128xf32> to vector<2x64xf32>
    %c4 = arith.constant 4 : index
    %c0_52 = arith.constant 0 : index
    %c0_53 = arith.constant 0 : index
    %166 = vector.load %arg3[%c4, %c0_52, %c0_53] : memref<8x2x64xf32, #tpu.memory_space<vmem>>, vector<1x2x64xf32>
    %167 = vector.shape_cast %166 : vector<1x2x64xf32> to vector<2x64xf32>
    %168 = vector.shape_cast %165 : vector<2x64xf32> to vector<1x2x64xf32>
    tpu.vector_store %arg3[%c4, %c0_52, %c0_53], %168 {strides = array<i32>} : memref<8x2x64xf32, #tpu.memory_space<vmem>>, vector<1x2x64xf32>,
    %c6 = arith.constant 6 : index
    %c0_54 = arith.constant 0 : index
    %c0_55 = arith.constant 0 : index
    %169 = vector.load %arg1[%c6, %c0_54, %c0_55] : memref<8x2x512xf32, #tpu.memory_space<vmem>>, vector<1x2x512xf32>
    %170 = vector.shape_cast %169 : vector<1x2x512xf32> to vector<2x512xf32>
    %cst_56 = arith.constant dense<0.000000e+00> : vector<2x512xf32>
    %171 = tpu.matmul %164, %3, %cst_56 {dimension_numbers = #tpu.dot_dimension_numbers<[1], [0], [0], [1], [0, 0, 1, 1], [], []>} : vector<2x128xf32>, vector<128x512xf32>, vector<2x512xf32> -> vector<2x512xf32>
    %172 = arith.addf %170, %171 : vector<2x512xf32>
    %173 = math.tanh %172 : vector<2x512xf32>
    %cst_57 = arith.constant 5.000000e-01 : f32
    %174 = vector.broadcast %cst_57 : f32 to vector<2x512xf32>
    %175 = arith.mulf %174, %173 : vector<2x512xf32>
    %cst_58 = arith.constant 5.000000e-01 : f32
    %176 = vector.broadcast %cst_58 : f32 to vector<2x512xf32>
    %177 = arith.addf %175, %176 : vector<2x512xf32>
    %178 = arith.select %9, %173, %177 : vector<2x512xi1>, vector<2x512xf32>
    %179 = vector.extract_strided_slice %178 {offsets = [0, 128], sizes = [2, 128], strides = [1, 1]} : vector<2x512xf32> to vector<2x128xf32>
    %180 = arith.mulf %179, %161 : vector<2x128xf32>
    %181 = vector.extract_strided_slice %178 {offsets = [0, 0], sizes = [2, 128], strides = [1, 1]} : vector<2x512xf32> to vector<2x128xf32>
    %182 = vector.extract_strided_slice %178 {offsets = [0, 256], sizes = [2, 128], strides = [1, 1]} : vector<2x512xf32> to vector<2x128xf32>
    %183 = arith.mulf %181, %182 : vector<2x128xf32>
    %184 = arith.addf %180, %183 : vector<2x128xf32>
    %185 = vector.extract_strided_slice %178 {offsets = [0, 384], sizes = [2, 128], strides = [1, 1]} : vector<2x512xf32> to vector<2x128xf32>
    %186 = math.tanh %184 : vector<2x128xf32>
    %187 = arith.mulf %185, %186 : vector<2x128xf32>
    %188 = vector.extract_strided_slice %187 {offsets = [0, 64], sizes = [2, 64], strides = [1, 1]} : vector<2x128xf32> to vector<2x64xf32>
    %c5_59 = arith.constant 5 : index
    %c0_60 = arith.constant 0 : index
    %c0_61 = arith.constant 0 : index
    %189 = vector.load %arg3[%c5_59, %c0_60, %c0_61] : memref<8x2x64xf32, #tpu.memory_space<vmem>>, vector<1x2x64xf32>
    %190 = vector.shape_cast %189 : vector<1x2x64xf32> to vector<2x64xf32>
    %191 = vector.shape_cast %188 : vector<2x64xf32> to vector<1x2x64xf32>
    tpu.vector_store %arg3[%c5_59, %c0_60, %c0_61], %191 {strides = array<i32>} : memref<8x2x64xf32, #tpu.memory_space<vmem>>, vector<1x2x64xf32>,
    %c7 = arith.constant 7 : index
    %c0_62 = arith.constant 0 : index
    %c0_63 = arith.constant 0 : index
    %192 = vector.load %arg1[%c7, %c0_62, %c0_63] : memref<8x2x512xf32, #tpu.memory_space<vmem>>, vector<1x2x512xf32>
    %193 = vector.shape_cast %192 : vector<1x2x512xf32> to vector<2x512xf32>
    %cst_64 = arith.constant dense<0.000000e+00> : vector<2x512xf32>
    %194 = tpu.matmul %187, %3, %cst_64 {dimension_numbers = #tpu.dot_dimension_numbers<[1], [0], [0], [1], [0, 0, 1, 1], [], []>} : vector<2x128xf32>, vector<128x512xf32>, vector<2x512xf32> -> vector<2x512xf32>
    %195 = arith.addf %193, %194 : vector<2x512xf32>
    %196 = math.tanh %195 : vector<2x512xf32>
    %cst_65 = arith.constant 5.000000e-01 : f32
    %197 = vector.broadcast %cst_65 : f32 to vector<2x512xf32>
    %198 = arith.mulf %197, %196 : vector<2x512xf32>
    %cst_66 = arith.constant 5.000000e-01 : f32
    %199 = vector.broadcast %cst_66 : f32 to vector<2x512xf32>
    %200 = arith.addf %198, %199 : vector<2x512xf32>
    %201 = arith.select %9, %196, %200 : vector<2x512xi1>, vector<2x512xf32>
    %202 = vector.extract_strided_slice %201 {offsets = [0, 128], sizes = [2, 128], strides = [1, 1]} : vector<2x512xf32> to vector<2x128xf32>
    %203 = arith.mulf %202, %184 : vector<2x128xf32>
    %204 = vector.extract_strided_slice %201 {offsets = [0, 0], sizes = [2, 128], strides = [1, 1]} : vector<2x512xf32> to vector<2x128xf32>
    %205 = vector.extract_strided_slice %201 {offsets = [0, 256], sizes = [2, 128], strides = [1, 1]} : vector<2x512xf32> to vector<2x128xf32>
    %206 = arith.mulf %204, %205 : vector<2x128xf32>
    %207 = arith.addf %203, %206 : vector<2x128xf32>
    %208 = vector.extract_strided_slice %201 {offsets = [0, 384], sizes = [2, 128], strides = [1, 1]} : vector<2x512xf32> to vector<2x128xf32>
    %209 = math.tanh %207 : vector<2x128xf32>
    %210 = arith.mulf %208, %209 : vector<2x128xf32>
    %211 = vector.extract_strided_slice %210 {offsets = [0, 64], sizes = [2, 64], strides = [1, 1]} : vector<2x128xf32> to vector<2x64xf32>
    %c6_67 = arith.constant 6 : index
    %c0_68 = arith.constant 0 : index
    %c0_69 = arith.constant 0 : index
    %212 = vector.load %arg3[%c6_67, %c0_68, %c0_69] : memref<8x2x64xf32, #tpu.memory_space<vmem>>, vector<1x2x64xf32>
    %213 = vector.shape_cast %212 : vector<1x2x64xf32> to vector<2x64xf32>
    %214 = vector.shape_cast %211 : vector<2x64xf32> to vector<1x2x64xf32>
    tpu.vector_store %arg3[%c6_67, %c0_68, %c0_69], %214 {strides = array<i32>} : memref<8x2x64xf32, #tpu.memory_space<vmem>>, vector<1x2x64xf32>,
    %c0_70 = arith.constant 0 : index
    %c0_71 = arith.constant 0 : index
    %c0_72 = arith.constant 0 : index
    %215 = vector.load %arg1[%c0_70, %c0_71, %c0_72] : memref<8x2x512xf32, #tpu.memory_space<vmem>>, vector<1x2x512xf32>
    %216 = vector.shape_cast %215 : vector<1x2x512xf32> to vector<2x512xf32>
    %cst_73 = arith.constant dense<0.000000e+00> : vector<2x512xf32>
    %217 = tpu.matmul %210, %3, %cst_73 {dimension_numbers = #tpu.dot_dimension_numbers<[1], [0], [0], [1], [0, 0, 1, 1], [], []>} : vector<2x128xf32>, vector<128x512xf32>, vector<2x512xf32> -> vector<2x512xf32>
    %218 = arith.addf %216, %217 : vector<2x512xf32>
    %219 = math.tanh %218 : vector<2x512xf32>
    %cst_74 = arith.constant 5.000000e-01 : f32
    %220 = vector.broadcast %cst_74 : f32 to vector<2x512xf32>
    %221 = arith.mulf %220, %219 : vector<2x512xf32>
    %cst_75 = arith.constant 5.000000e-01 : f32
    %222 = vector.broadcast %cst_75 : f32 to vector<2x512xf32>
    %223 = arith.addf %221, %222 : vector<2x512xf32>
    %224 = arith.select %9, %219, %223 : vector<2x512xi1>, vector<2x512xf32>
    %225 = vector.extract_strided_slice %224 {offsets = [0, 192], sizes = [2, 64], strides = [1, 1]} : vector<2x512xf32> to vector<2x64xf32>
    %226 = vector.extract_strided_slice %207 {offsets = [0, 64], sizes = [2, 64], strides = [1, 1]} : vector<2x128xf32> to vector<2x64xf32>
    %227 = arith.mulf %225, %226 : vector<2x64xf32>
    %228 = vector.extract_strided_slice %224 {offsets = [0, 64], sizes = [2, 64], strides = [1, 1]} : vector<2x512xf32> to vector<2x64xf32>
    %229 = vector.extract_strided_slice %224 {offsets = [0, 320], sizes = [2, 64], strides = [1, 1]} : vector<2x512xf32> to vector<2x64xf32>
    %230 = arith.mulf %228, %229 : vector<2x64xf32>
    %231 = arith.addf %227, %230 : vector<2x64xf32>
    %232 = vector.extract_strided_slice %224 {offsets = [0, 448], sizes = [2, 64], strides = [1, 1]} : vector<2x512xf32> to vector<2x64xf32>
    %233 = math.tanh %231 : vector<2x64xf32>
    %234 = arith.mulf %232, %233 : vector<2x64xf32>
    %c7_76 = arith.constant 7 : index
    %c0_77 = arith.constant 0 : index
    %c0_78 = arith.constant 0 : index
    %235 = vector.load %arg3[%c7_76, %c0_77, %c0_78] : memref<8x2x64xf32, #tpu.memory_space<vmem>>, vector<1x2x64xf32>
    %236 = vector.shape_cast %235 : vector<1x2x64xf32> to vector<2x64xf32>
    %237 = vector.shape_cast %234 : vector<2x64xf32> to vector<1x2x64xf32>
    tpu.vector_store %arg3[%c7_76, %c0_77, %c0_78], %237 {strides = array<i32>} : memref<8x2x64xf32, #tpu.memory_space<vmem>>, vector<1x2x64xf32>,
    %238 = vector.extract_strided_slice %210 {offsets = [0, 0], sizes = [2, 64], strides = [1, 1]} : vector<2x128xf32> to vector<2x64xf32>
    %239 = tpu.concatenate %238, %234 in 1 : vector<2x64xf32>, vector<2x64xf32> -> vector<2x128xf32>
    %c0_79 = arith.constant 0 : index
    %c0_80 = arith.constant 0 : index
    %240 = vector.load %arg4[%c0_79, %c0_80] : memref<2x128xf32, #tpu.memory_space<vmem>>, vector<2x128xf32>
    tpu.vector_store %arg4[%c0_79, %c0_80], %239 {strides = array<i32>} : memref<2x128xf32, #tpu.memory_space<vmem>>, vector<2x128xf32>,
    %241 = vector.extract_strided_slice %207 {offsets = [0, 0], sizes = [2, 64], strides = [1, 1]} : vector<2x128xf32> to vector<2x64xf32>
    %242 = tpu.concatenate %241, %231 in 1 : vector<2x64xf32>, vector<2x64xf32> -> vector<2x128xf32>
    %c0_81 = arith.constant 0 : index
    %c0_82 = arith.constant 0 : index
    %243 = vector.load %arg5[%c0_81, %c0_82] : memref<2x128xf32, #tpu.memory_space<vmem>>, vector<2x128xf32>
    tpu.vector_store %arg5[%c0_81, %c0_82], %242 {strides = array<i32>} : memref<2x128xf32, #tpu.memory_space<vmem>>, vector<2x128xf32>,
    return
  }
  func.func @transform_0(%arg0: i32) -> (i32, i32, i32) {
    %c0_i32 = arith.constant 0 : i32
    %c0_i32_0 = arith.constant 0 : i32
    %c0_i32_1 = arith.constant 0 : i32
    return %arg0, %c0_i32, %c0_i32_0 : i32, i32, i32
  }
  func.func @transform_1(%arg0: i32) -> (i32, i32) {
    %c0_i32 = arith.constant 0 : i32
    %c0_i32_0 = arith.constant 0 : i32
    %c0_i32_1 = arith.constant 0 : i32
    return %c0_i32, %c0_i32_0 : i32, i32
  }
  func.func @transform_2(%arg0: i32) -> (i32, i32, i32) {
    %c0_i32 = arith.constant 0 : i32
    %c0_i32_0 = arith.constant 0 : i32
    %c0_i32_1 = arith.constant 0 : i32
    return %arg0, %c0_i32, %c0_i32_0 : i32, i32, i32
  }
}

</mosaic_0001>

<bundles_post_ra>
// kernel: tpu_custom_call.1
= control target key start
LH: loop header
LB: loop body
LE: loop exit
PB: predicated region body
PF: predicated region fallthrough
CT: control target
= control target key end

     0   :  { %7 = vsyncpa [#allocation5], 0  ;;  %s3443_s0 = inlined_call_operand.hbm [shape: f32[8,2,512], index: 0, kind: input, shape index: {}]   ;;  %s3444_s1 = inlined_call_operand.hbm [shape: f32[128,512], index: 1, kind: input, shape index: {}]   ;;  %s3445_s2 = inlined_call_operand.hbm [shape: f32[8,2,64], index: 2, kind: output, shape index: {}]  }
   0x1   :  { %8 = vsyncpa [#allocation8], 0 }
   0x2   :  { %9 = vsyncpa [#allocation6], 0  ;;  %s2902_s9 = smov [#allocation4]   ;;  %s2830_s13 = scalar_lea.hbm %s3443_s0, 1024 }
   0x3   :  { %s15_s10 = sshll.u32 %s2902_s9, 4  ;;  %p2831_p0 = scmp.ne.s32.totalorder %s3443_s0, %s2830_s13  ;;  %s16_s10 = int_to_ptr.vmem [resolvable:$true] %s15_s10 }
   0x4   :  { %p2834_p1 = scmp.lt.u32.totalorder %s2830_s13, %s3443_s0 }
   0x6   :  { %p2836_p2 = pnand %p2834_p1, %p2831_p0 }
   0x8   :  { %2839 = shalt.err (!%p2836_p2)
}
   0x9   :  { %s2840_s18 = scalar_lea.vmem %s16_s10, 1024  ;;  %p2845_p4 = scmp.lt.s32.totalorder %s16_s10, %s16_s10 }
   0xa   :  { %p2841_p3 = scmp.ne.s32.totalorder %s16_s10, %s2840_s18  ;;  %p2846_p5 = scmp.lt.s32.totalorder %s2840_s18, %s2840_s18 }
   0xc   :  { %p2847_p6 = por %p2846_p5, %p2845_p4 }
   0xe   :  { %p2848_p7 = pnand %p2847_p6, %p2841_p3 }
  0x10   :  { %2851 = shalt.err (!%p2848_p7)
}
  0x11   :  { %s2903_s19 = smov 128   ;;  %s2904_s20 = smov 8  }
  0x12   :  { %21 = dma.hbm_to_vmem [thread:$0]  %s3443_s0, 1024, %s16_s10, [#allocation5], %s2903_s19, %s2903_s19, %s2904_s20  }
  0x13   :  { %s2905_s23 = smov [#allocation7]   ;;  %s2852_s27 = scalar_lea.hbm %s3444_s1, 8192 }
  0x14   :  { %s27_s24 = sshll.u32 %s2905_s23, 4  ;;  %p2853_p8 = scmp.ne.s32.totalorder %s3444_s1, %s2852_s27  ;;  %s28_s24 = int_to_ptr.vmem [resolvable:$true] %s27_s24 }
  0x15   :  { %p2856_p9 = scmp.lt.u32.totalorder %s2852_s27, %s3444_s1 }
  0x17   :  { %p2858_p10 = pnand %p2856_p9, %p2853_p8 }
  0x19   :  { %2861 = shalt.err (!%p2858_p10)
}
  0x1a   :  { %s2862_s4 = scalar_lea.vmem %s28_s24, 8192  ;;  %p2867_p12 = scmp.lt.s32.totalorder %s28_s24, %s28_s24 }
  0x1b   :  { %p2863_p11 = scmp.ne.s32.totalorder %s28_s24, %s2862_s4  ;;  %p2868_p13 = scmp.lt.s32.totalorder %s2862_s4, %s2862_s4 }
  0x1d   :  { %p2869_p0 = por %p2868_p13, %p2867_p12 }
  0x1f   :  { %p2870_p1 = pnand %p2869_p0, %p2863_p11 }
  0x21   :  { %2873 = shalt.err (!%p2870_p1)
}
  0x22   :  { %s2906_s0 = smov 512   ;;  %s2907_s5 = smov 32  }
  0x23   :  { %33 = dma.hbm_to_vmem [thread:$0]  %s3444_s1, 8192, %s28_s24, [#allocation8], %s2906_s0, %s2906_s0, %s2907_s5  }
  0x24   :  { %2896 = dma.done.wait [#allocation5], 1024  }
  0x25   :  { %2897 = vsyncadd [#allocation5], 4294966272 }
  0x26   :  { %2898 = dma.done.wait [#allocation8], 8192  }
  0x27   :  { %2899 = vsyncadd [#allocation8], 4294959104  ;;  %v2908_v0 = vmov 0.0   ;;  %v47_v1 = vld [vmem:[#allocation7 + $0x8] sm:$0xff]  ;;  %v49_v3 = vld [vmem:[#allocation7 + $0x18] sm:$0xff]  ;;  %vm351_vm0 = vcmask 523264  }
  0x28   :  { %194 = vmatprep.mubr.f32.mxu0 %v2908_v0  ;;  %44 = vst [vmem:[#allocation2] sm:$0x3] %v2908_v0  ;;  %45 = vst [vmem:[#allocation3] sm:$0x3] %v2908_v0  ;;  %265 = vmatprep.mubr.f32.mxu1 %v2908_v0  ;;  %v51_v2 = vld [vmem:[#allocation7 + $0x28] sm:$0xff]  ;;  %v53_v5 = vld [vmem:[#allocation7 + $0x38] sm:$0xff] }
  0x29   :  { %v2957_v4 = vpack.c.bf16 %v51_v2, %v47_v1  ;;  %v46_v6 = vld [vmem:[#allocation7] sm:$0xff]  ;;  %v2959_v8 = vpack.c.bf16 %v53_v5, %v49_v3  ;;  %v48_v10 = vld [vmem:[#allocation7 + $0x10] sm:$0xff]  ;;  %v55_v12 = vld [vmem:[#allocation7 + $0x48] sm:$0xff]  ;;  %s2910_s1 = smov 64   ;;  %vm581_vm1 = vcmask 517120   ;;  %s2911_s8 = smov [#allocation9]  }
  0x2a   :  { %v50_v7 = vld [vmem:[#allocation7 + $0x20] sm:$0xff]  ;;  %v52_v11 = vld [vmem:[#allocation7 + $0x30] sm:$0xff]  ;;  %v59_v14 = vld [vmem:[#allocation7 + $0x68] sm:$0xff]  ;;  %s2194_s9 = sshll.u32 %s2911_s8, 4  ;;  %s2195_s9 = int_to_ptr.vmem [resolvable:$true] %s2194_s9 }
  0x2b   :  { %v2961_v9 = vpack.c.bf16 %v50_v7, %v46_v6  ;;  %2208 = vmatprep.subr.bf16.mxu0 %v2957_v4  ;;  %v2964_v13 = vpack.c.bf16 %v52_v11, %v48_v10  ;;  %v57_v15 = vld [vmem:[#allocation7 + $0x58] sm:$0xff]  ;;  %2240 = vmatprep.subr.bf16.mxu1 %v2959_v8  ;;  %v2968_v17 = vpack.c.bf16 %v59_v14, %v55_v12  ;;  %v54_v19 = vld [vmem:[#allocation7 + $0x40] sm:$0xff]  ;;  %v56_v21 = vld [vmem:[#allocation7 + $0x50] sm:$0xff]  ;;  %s2874_s10 = scalar_lea.vmem %s2195_s9, 256  ;;  %p2879_p3 = scmp.lt.s32.totalorder %s2195_s9, %s2195_s9 }
  0x2c   :  { %v61_v16 = vld [vmem:[#allocation7 + $0x78] sm:$0xff]  ;;  %v58_v20 = vld [vmem:[#allocation7 + $0x60] sm:$0xff]  ;;  %v60_v23 = vld [vmem:[#allocation7 + $0x70] sm:$0xff]  ;;  %p2875_p2 = scmp.ne.s32.totalorder %s2195_s9, %s2874_s10  ;;  %p2880_p4 = scmp.lt.s32.totalorder %s2874_s10, %s2874_s10 }
  0x2d   :  { %2210 = vmatpush1.bf16.msra.mxu0 %v2961_v9  ;;  %v2970_v18 = vpack.c.bf16 %v61_v16, %v57_v15  ;;  %2242 = vmatpush1.bf16.msra.mxu1 %v2964_v13  ;;  %v2973_v22 = vpack.c.bf16 %v58_v20, %v54_v19  ;;  %v63_v24 = vld [vmem:[#allocation7 + $0x88] sm:$0xff]  ;;  %v2977_v26 = vpack.c.bf16 %v60_v23, %v56_v21  ;;  %v65_v28 = vld [vmem:[#allocation7 + $0x98] sm:$0xff]  ;;  %v62_v30 = vld [vmem:[#allocation7 + $0x80] sm:$0xff] }
  0x2e   :  { %v67_v25 = vld [vmem:[#allocation7 + $0xa8] sm:$0xff]  ;;  %2212 = vmatprep.subr.bf16.mxu0 %v2968_v17  ;;  %v69_v29 = vld [vmem:[#allocation7 + $0xb8] sm:$0xff]  ;;  %v66_v32 = vld [vmem:[#allocation7 + $0xa0] sm:$0xff]  ;;  %p2881_p5 = por %p2880_p4, %p2879_p3 }
  0x2f   :  { %2244 = vmatprep.subr.bf16.mxu1 %v2970_v18  ;;  %v2979_v27 = vpack.c.bf16 %v67_v25, %v63_v24  ;;  %v2981_v31 = vpack.c.bf16 %v69_v29, %v65_v28  ;;  %v64_v33 = vld [vmem:[#allocation7 + $0x90] sm:$0xff]  ;;  %v2984_v35 = vpack.c.bf16 %v66_v32, %v62_v30  ;;  %v71_v36 = vld [vmem:[#allocation7 + $0xc8] sm:$0xff]  ;;  %v73_v38 = vld [vmem:[#allocation7 + $0xd8] sm:$0xff] }
  0x30   :  { %v68_v34 = vld [vmem:[#allocation7 + $0xb0] sm:$0xff]  ;;  %v75_v37 = vld [vmem:[#allocation7 + $0xe8] sm:$0xff]  ;;  %v77_v41 = vld [vmem:[#allocation7 + $0xf8] sm:$0xff]  ;;  %p2882_p6 = pnand %p2881_p5, %p2875_p2 }
  0x31   :  { %2214 = vmatpush1.bf16.msra.mxu0 %v2973_v22  ;;  %2246 = vmatpush1.bf16.msra.mxu1 %v2977_v26  ;;  %v2988_v39 = vpack.c.bf16 %v68_v34, %v64_v33  ;;  %v2990_v40 = vpack.c.bf16 %v75_v37, %v71_v36  ;;  %v70_v42 = vld [vmem:[#allocation7 + $0xc0] sm:$0xff]  ;;  %v2993_v44 = vpack.c.bf16 %v77_v41, %v73_v38  ;;  %v72_v45 = vld [vmem:[#allocation7 + $0xd0] sm:$0xff]  ;;  %v79_v47 = vld [vmem:[#allocation7 + $0x108] sm:$0xff] }
  0x32   :  { %2216 = vmatprep.subr.bf16.mxu0 %v2979_v27  ;;  %v74_v43 = vld [vmem:[#allocation7 + $0xe0] sm:$0xff]  ;;  %2248 = vmatprep.subr.bf16.mxu1 %v2981_v31  ;;  %v76_v46 = vld [vmem:[#allocation7 + $0xf0] sm:$0xff]  ;;  %v83_v48 = vld [vmem:[#allocation7 + $0x128] sm:$0xff] }
  0x33   :  { %v81_v49 = vld [vmem:[#allocation7 + $0x118] sm:$0xff]  ;;  %v2996_v51 = vpack.c.bf16 %v74_v43, %v70_v42  ;;  %v3000_v52 = vpack.c.bf16 %v76_v46, %v72_v45  ;;  %v3002_v53 = vpack.c.bf16 %v83_v48, %v79_v47  ;;  %v78_v54 = vld [vmem:[#allocation7 + $0x100] sm:$0xff]  ;;  %v80_v56 = vld [vmem:[#allocation7 + $0x110] sm:$0xff] }
  0x34   :  { %v85_v50 = vld [vmem:[#allocation7 + $0x138] sm:$0xff]  ;;  %v82_v55 = vld [vmem:[#allocation7 + $0x120] sm:$0xff]  ;;  %v84_v58 = vld [vmem:[#allocation7 + $0x130] sm:$0xff] }
  0x35   :  { %2218 = vmatpush1.bf16.msra.mxu0 %v2984_v35  ;;  %2250 = vmatpush1.bf16.msra.mxu1 %v2988_v39  ;;  %v3005_v57 = vpack.c.bf16 %v85_v50, %v81_v49  ;;  %v87_v59 = vld [vmem:[#allocation7 + $0x148] sm:$0xff]  ;;  %v89_v61 = vld [vmem:[#allocation7 + $0x158] sm:$0xff]  ;;  %v3008_v63 = vpack.c.bf16 %v82_v55, %v78_v54  ;;  %v3012_v1 = vpack.c.bf16 %v84_v58, %v80_v56  ;;  %v86_v3 = vld [vmem:[#allocation7 + $0x140] sm:$0xff]  ;;  %v2909_v49 = vmov 1983009808  }
  0x36   :  { %2220 = vmatprep.subr.bf16.mxu0 %v2990_v40  ;;  %2252 = vmatprep.subr.bf16.mxu1 %v2993_v44  ;;  %v91_v60 = vld [vmem:[#allocation7 + $0x168] sm:$0xff]  ;;  %v93_v62 = vld [vmem:[#allocation7 + $0x178] sm:$0xff]  ;;  %v90_v5 = vld [vmem:[#allocation7 + $0x160] sm:$0xff]  ;;  %v279_v50 = vunpack.c.l.s4 %v2909_v49  ;;  %v281_v54 = vlaneseq }
  0x37   :  { %v3014_v2 = vpack.c.bf16 %v91_v60, %v87_v59  ;;  %v88_v6 = vld [vmem:[#allocation7 + $0x150] sm:$0xff]  ;;  %v3017_v7 = vpack.c.bf16 %v93_v62, %v89_v61  ;;  %v95_v11 = vld [vmem:[#allocation7 + $0x188] sm:$0xff]  ;;  %v97_v14 = vld [vmem:[#allocation7 + $0x198] sm:$0xff]  ;;  %v3020_v16 = vpack.c.bf16 %v90_v5, %v86_v3 }
  0x38   :  { %v92_v10 = vld [vmem:[#allocation7 + $0x170] sm:$0xff]  ;;  %v99_v12 = vld [vmem:[#allocation7 + $0x1a8] sm:$0xff]  ;;  %v101_v15 = vld [vmem:[#allocation7 + $0x1b8] sm:$0xff]  ;;  %v280_v55 = vunpack.c.0.s8 %v279_v50  ;;  %v282_v56 = vshrl.u32 %v281_v54, 7 }
  0x39   :  { %2222 = vmatpush1.bf16.msra.mxu0 %v2996_v51  ;;  %2254 = vmatpush1.bf16.msra.mxu1 %v3000_v52  ;;  %v3024_v19 = vpack.c.bf16 %v92_v10, %v88_v6  ;;  %v3026_v20 = vpack.c.bf16 %v99_v12, %v95_v11  ;;  %v94_v21 = vld [vmem:[#allocation7 + $0x180] sm:$0xff]  ;;  %v96_v24 = vld [vmem:[#allocation7 + $0x190] sm:$0xff]  ;;  %v3029_v25 = vpack.c.bf16 %v101_v15, %v97_v14  ;;  %v103_v29 = vld [vmem:[#allocation7 + $0x1c8] sm:$0xff] }
  0x3a   :  { %2224 = vmatprep.subr.bf16.mxu0 %v3002_v53  ;;  %2256 = vmatprep.subr.bf16.mxu1 %v3005_v57  ;;  %v98_v23 = vld [vmem:[#allocation7 + $0x1a0] sm:$0xff]  ;;  %v100_v28 = vld [vmem:[#allocation7 + $0x1b0] sm:$0xff]  ;;  %v107_v30 = vld [vmem:[#allocation7 + $0x1e8] sm:$0xff]  ;;  %v3093_v59 = vsub.s32 %v280_v55, %v282_v56 }
  0x3b   :  { %v105_v32 = vld [vmem:[#allocation7 + $0x1d8] sm:$0xff]  ;;  %v3032_v34 = vpack.c.bf16 %v98_v23, %v94_v21  ;;  %v3036_v36 = vpack.c.bf16 %v100_v28, %v96_v24  ;;  %v3038_v37 = vpack.c.bf16 %v107_v30, %v103_v29  ;;  %v102_v38 = vld [vmem:[#allocation7 + $0x1c0] sm:$0xff]  ;;  %v104_v43 = vld [vmem:[#allocation7 + $0x1d0] sm:$0xff] }
  0x3c   :  { %v109_v33 = vld [vmem:[#allocation7 + $0x1f8] sm:$0xff]  ;;  %v106_v41 = vld [vmem:[#allocation7 + $0x1e0] sm:$0xff]  ;;  %v108_v45 = vld [vmem:[#allocation7 + $0x1f0] sm:$0xff] }
  0x3d   :  { %2226 = vmatpush1.bf16.msra.mxu0 %v3008_v63  ;;  %2258 = vmatpush1.bf16.msra.mxu1 %v3012_v1  ;;  %v3041_v42 = vpack.c.bf16 %v109_v33, %v105_v32  ;;  %v3044_v46 = vpack.c.bf16 %v106_v41, %v102_v38  ;;  %v3048_v47 = vpack.c.bf16 %v108_v45, %v104_v43  ;;  %v3052_v48 = vld [vmem:[#allocation2] sm:$0x3]  ;;  %v129_v11 = vld [vmem:[#allocation4] sm:$0xff]  ;;  %v3098_v29 = vld [vmem:[#allocation3] sm:$0x3] }
  0x3e   :  { %2228 = vmatprep.subr.bf16.mxu0 %v3014_v2  ;;  %2260 = vmatprep.subr.bf16.mxu1 %v3017_v7 }
  0x41   :  { %2230 = vmatpush1.bf16.msra.mxu0 %v3020_v16  ;;  %2262 = vmatpush1.bf16.msra.mxu1 %v3024_v19 }
  0x42   :  { %2232 = vmatprep.subr.bf16.mxu0 %v3026_v20  ;;  %2264 = vmatprep.subr.bf16.mxu1 %v3029_v25 }
  0x45   :  { %2234 = vmatpush1.bf16.msra.mxu0 %v3032_v34  ;;  %2266 = vmatpush1.bf16.msra.mxu1 %v3036_v36 }
  0x46   :  { %2236 = vmatprep.subr.bf16.mxu0 %v3038_v37  ;;  %2268 = vmatprep.subr.bf16.mxu1 %v3041_v42 }
  0x49   :  { %2238 = vmatpush1.bf16.msra.mxu0 %v3044_v46  ;;  %2270 = vmatpush1.bf16.msra.mxu1 %v3048_v47 }
  0x4a   :  { %2272 = vmatprep.subr.bf16.mxu0 %v2957_v4  ;;  %2304 = vmatprep.subr.bf16.mxu1 %v2959_v8 }
  0x4c   :  { %195 = vmatmul.mubr.f32.vlgmr.msra.gmra.mrb[0].mxu0 %v3052_v48  ;;  %266 = vmatmul.mubr.f32.vlgmr.msra.gmra.mrb[0].mxu1 %v3052_v48 }
  0x4d   :  { %2274 = vmatpush1.bf16.msra.mxu0 %v2961_v9  ;;  %2306 = vmatpush1.bf16.msra.mxu1 %v2964_v13 }
  0x4e   :  { %2276 = vmatprep.subr.bf16.mxu0 %v2968_v17  ;;  %2308 = vmatprep.subr.bf16.mxu1 %v2970_v18 }
  0x4f   :  { %420 = vmatprep.mubr.f32.mxu0 %v2908_v0  ;;  %491 = vmatprep.mubr.f32.mxu1 %v2908_v0 }
  0x51   :  { %2278 = vmatpush1.bf16.msra.mxu0 %v2973_v22  ;;  %2310 = vmatpush1.bf16.msra.mxu1 %v2977_v26 }
  0x52   :  { %2280 = vmatprep.subr.bf16.mxu0 %v2979_v27  ;;  %2312 = vmatprep.subr.bf16.mxu1 %v2981_v31 }
  0x55   :  { %2282 = vmatpush1.bf16.msra.mxu0 %v2984_v35  ;;  %2314 = vmatpush1.bf16.msra.mxu1 %v2988_v39 }
  0x56   :  { %2284 = vmatprep.subr.bf16.mxu0 %v2990_v40  ;;  %2316 = vmatprep.subr.bf16.mxu1 %v2993_v44 }
  0x59   :  { %2286 = vmatpush1.bf16.msra.mxu0 %v2996_v51  ;;  %2318 = vmatpush1.bf16.msra.mxu1 %v3000_v52 }
  0x5a   :  { %2288 = vmatprep.subr.bf16.mxu0 %v3002_v53  ;;  %2320 = vmatprep.subr.bf16.mxu1 %v3005_v57 }
  0x5d   :  { %2290 = vmatpush1.bf16.msra.mxu0 %v3008_v63  ;;  %2322 = vmatpush1.bf16.msra.mxu1 %v3012_v1 }
  0x5e   :  { %2292 = vmatprep.subr.bf16.mxu0 %v3014_v2  ;;  %2324 = vmatprep.subr.bf16.mxu1 %v3017_v7 }
  0x61   :  { %2294 = vmatpush1.bf16.msra.mxu0 %v3020_v16  ;;  %2326 = vmatpush1.bf16.msra.mxu1 %v3024_v19 }
  0x62   :  { %2296 = vmatprep.subr.bf16.mxu0 %v3026_v20  ;;  %2328 = vmatprep.subr.bf16.mxu1 %v3029_v25 }
  0x65   :  { %2298 = vmatpush1.bf16.msra.mxu0 %v3032_v34  ;;  %2330 = vmatpush1.bf16.msra.mxu1 %v3036_v36 }
  0x66   :  { %2300 = vmatprep.subr.bf16.mxu0 %v3038_v37  ;;  %2332 = vmatprep.subr.bf16.mxu1 %v3041_v42 }
  0x69   :  { %2302 = vmatpush1.bf16.msra.mxu0 %v3044_v46  ;;  %2334 = vmatpush1.bf16.msra.mxu1 %v3048_v47 }
  0x6a   :  { %2336 = vmatprep.subr.bf16.mxu0 %v2957_v4  ;;  %2368 = vmatprep.subr.bf16.mxu1 %v2959_v8 }
 0x11f   :  { %v196_v58 = vpop.f32.mrb[0].mxu0  ;;  %v267_v60 = vpop.f32.mrb[0].mxu1 }
 0x120   :  { %v198_v61 = vpop.f32.mrb[1].mxu0  ;;  %v269_v3 = vpop.f32.mrb[1].mxu1 }
 0x121   :  { %v276_v62 = vcombine.low %v196_v58, %v198_v61  ;;  %v277_v5 = vcombine.low %v267_v60, %v269_v3 }
 0x123   :  { %v284_v6 = vrot.slane %v276_v62, %v3093_v59  ;;  %v291_v10 = vrot.slane %v277_v5, %v3093_v59 }
 0x125   :  { %v292_v12 = vcombine.low %v284_v6, %v291_v10  ;;  %v355_v6 = vld [vmem:[#allocation4 + $0x8] sm:$0xff] }
 0x127   :  { %v294_v14 = vadd.f32 %v292_v12, %v129_v11 }
 0x129   :  { %2794 = vtanh.f32 %v294_v14 }
 0x133   :  { %v2795_v15 = vpop.eup %2794 }
 0x134   :  { %v296_v21 = vmul.f32 0.5, %v2795_v15  ;;  %v299_v23 = vcombine.high %v2795_v15, %v2795_v15 }
 0x136   :  { %v297_v24 = vadd.f32 0.5, %v296_v21  ;;  %v313_v30 = vrot.slane %v299_v23, %v3093_v59 }
 0x138   :  { %v328_v28 = vrot.slane %v297_v24, %v3093_v59  ;;  %v321_v43 = vcombine.high %v297_v24, %v297_v24 }
 0x13a   :  { %v336_v32 = vcombine.high %v328_v28, %v328_v28  ;;  %v347_v38 = vmul.f32 %v328_v28, %v313_v30  ;;  %v335_v45 = vrot.slane %v321_v43, %v3093_v59 }
 0x13c   :  { %v346_v33 = vmul.f32 %v336_v32, %v3098_v29  ;;  %v337_v49 = vcombine.high %v335_v45, %v335_v45 }
 0x13e   :  { %v3102_v41 = vadd.f32 %v347_v38, %v346_v33 }
 0x140   :  { %2796 = vtanh.f32 %v3102_v41  ;;  %v353_v30 = vsel %vm351_vm0, %v3102_v41, %v3098_v29 }
 0x14a   :  { %v2797_v50 = vpop.eup %2796 }
 0x14b   :  { %v350_v54 = vmul.f32 %v2797_v50, %v337_v49 }
 0x14d   :  { %v352_v55 = vsel %vm351_vm0, %v350_v54, %v3052_v48 }
 0x14e   :  { %421 = vmatmul.mubr.f32.vlgmr.msra.gmra.mrb[2].mxu0 %v352_v55  ;;  %492 = vmatmul.mubr.f32.vlgmr.msra.gmra.mrb[2].mxu1 %v352_v55 }
 0x14f   :  { %2338 = vmatpush1.bf16.msra.mxu0 %v2961_v9  ;;  %2370 = vmatpush1.bf16.msra.mxu1 %v2964_v13 }
 0x150   :  { %2340 = vmatprep.subr.bf16.mxu0 %v2968_v17  ;;  %2372 = vmatprep.subr.bf16.mxu1 %v2970_v18 }
 0x151   :  { %649 = vmatprep.mubr.f32.mxu0 %v2908_v0  ;;  %720 = vmatprep.mubr.f32.mxu1 %v2908_v0 }
 0x153   :  { %2342 = vmatpush1.bf16.msra.mxu0 %v2973_v22  ;;  %2374 = vmatpush1.bf16.msra.mxu1 %v2977_v26 }
 0x154   :  { %2344 = vmatprep.subr.bf16.mxu0 %v2979_v27  ;;  %2376 = vmatprep.subr.bf16.mxu1 %v2981_v31 }
 0x157   :  { %2346 = vmatpush1.bf16.msra.mxu0 %v2984_v35  ;;  %2378 = vmatpush1.bf16.msra.mxu1 %v2988_v39 }
 0x158   :  { %2348 = vmatprep.subr.bf16.mxu0 %v2990_v40  ;;  %2380 = vmatprep.subr.bf16.mxu1 %v2993_v44 }
 0x15b   :  { %2350 = vmatpush1.bf16.msra.mxu0 %v2996_v51  ;;  %2382 = vmatpush1.bf16.msra.mxu1 %v3000_v52 }
 0x15c   :  { %2352 = vmatprep.subr.bf16.mxu0 %v3002_v53  ;;  %2384 = vmatprep.subr.bf16.mxu1 %v3005_v57 }
 0x15f   :  { %2354 = vmatpush1.bf16.msra.mxu0 %v3008_v63  ;;  %2386 = vmatpush1.bf16.msra.mxu1 %v3012_v1 }
 0x160   :  { %2356 = vmatprep.subr.bf16.mxu0 %v3014_v2  ;;  %2388 = vmatprep.subr.bf16.mxu1 %v3017_v7 }
 0x163   :  { %2358 = vmatpush1.bf16.msra.mxu0 %v3020_v16  ;;  %2390 = vmatpush1.bf16.msra.mxu1 %v3024_v19 }
 0x164   :  { %2360 = vmatprep.subr.bf16.mxu0 %v3026_v20  ;;  %2392 = vmatprep.subr.bf16.mxu1 %v3029_v25 }
 0x167   :  { %2362 = vmatpush1.bf16.msra.mxu0 %v3032_v34  ;;  %2394 = vmatpush1.bf16.msra.mxu1 %v3036_v36 }
 0x168   :  { %2364 = vmatprep.subr.bf16.mxu0 %v3038_v37  ;;  %2396 = vmatprep.subr.bf16.mxu1 %v3041_v42 }
 0x16b   :  { %2366 = vmatpush1.bf16.msra.mxu0 %v3044_v46  ;;  %2398 = vmatpush1.bf16.msra.mxu1 %v3048_v47 }
 0x16c   :  { %2400 = vmatprep.subr.bf16.mxu0 %v2957_v4  ;;  %2432 = vmatprep.subr.bf16.mxu1 %v2959_v8 }
 0x221   :  { %v422_v48 = vpop.f32.mrb[2].mxu0  ;;  %v493_v56 = vpop.f32.mrb[2].mxu1 }
 0x222   :  { %v424_v58 = vpop.f32.mrb[3].mxu0  ;;  %v495_v60 = vpop.f32.mrb[3].mxu1 }
 0x223   :  { %v502_v61 = vcombine.low %v422_v48, %v424_v58  ;;  %v503_v62 = vcombine.low %v493_v56, %v495_v60 }
 0x225   :  { %v510_v3 = vrot.slane %v502_v61, %v3093_v59  ;;  %v517_v5 = vrot.slane %v503_v62, %v3093_v59 }
 0x227   :  { %v518_v10 = vcombine.low %v510_v3, %v517_v5  ;;  %v584_v3 = vld [vmem:[#allocation4 + $0x10] sm:$0xff] }
 0x229   :  { %v520_v11 = vadd.f32 %v518_v10, %v355_v6 }
 0x22b   :  { %2798 = vtanh.f32 %v520_v11 }
 0x235   :  { %v2799_v12 = vpop.eup %2798 }
 0x236   :  { %v522_v14 = vmul.f32 0.5, %v2799_v12  ;;  %v525_v15 = vcombine.high %v2799_v12, %v2799_v12 }
 0x238   :  { %v523_v21 = vadd.f32 0.5, %v522_v14  ;;  %v539_v24 = vrot.slane %v525_v15, %v3093_v59 }
 0x23a   :  { %v554_v23 = vrot.slane %v523_v21, %v3093_v59  ;;  %v547_v43 = vcombine.high %v523_v21, %v523_v21 }
 0x23c   :  { %v562_v28 = vcombine.high %v554_v23, %v554_v23  ;;  %v573_v33 = vmul.f32 %v554_v23, %v539_v24  ;;  %v561_v45 = vrot.slane %v547_v43, %v3093_v59 }
 0x23e   :  { %v572_v32 = vmul.f32 %v562_v28, %v353_v30  ;;  %v563_v49 = vcombine.high %v561_v45, %v561_v45 }
 0x240   :  { %v3149_v38 = vadd.f32 %v573_v33, %v572_v32 }
 0x242   :  { %2800 = vtanh.f32 %v3149_v38 }
 0x24c   :  { %v2801_v50 = vpop.eup %2800 }
 0x24d   :  { %v576_v54 = vmul.f32 %v2801_v50, %v563_v49 }
 0x24f   :  { %578 = vrot.lane.b32.xlu0 %v576_v54, %s2910_s1  ;;  %650 = vmatmul.mubr.f32.vlgmr.msra.gmra.mrb[4].mxu0 %v576_v54 }
 0x250   :  { %721 = vmatmul.mubr.f32.vlgmr.msra.gmra.mrb[4].mxu1 %v576_v54  ;;  %2402 = vmatpush1.bf16.msra.mxu0 %v2961_v9 }
 0x251   :  { %2434 = vmatpush1.bf16.msra.mxu1 %v2964_v13  ;;  %2404 = vmatprep.subr.bf16.mxu0 %v2968_v17 }
 0x252   :  { %2436 = vmatprep.subr.bf16.mxu1 %v2970_v18  ;;  %878 = vmatprep.mubr.f32.mxu0 %v2908_v0 }
 0x253   :  { %949 = vmatprep.mubr.f32.mxu1 %v2908_v0 }
 0x254   :  { %2406 = vmatpush1.bf16.msra.mxu0 %v2973_v22 }
 0x255   :  { %2438 = vmatpush1.bf16.msra.mxu1 %v2977_v26  ;;  %2408 = vmatprep.subr.bf16.mxu0 %v2979_v27 }
 0x256   :  { %2440 = vmatprep.subr.bf16.mxu1 %v2981_v31 }
 0x258   :  { %2410 = vmatpush1.bf16.msra.mxu0 %v2984_v35 }
 0x259   :  { %2442 = vmatpush1.bf16.msra.mxu1 %v2988_v39  ;;  %2412 = vmatprep.subr.bf16.mxu0 %v2990_v40 }
 0x25a   :  { %2444 = vmatprep.subr.bf16.mxu1 %v2993_v44 }
 0x25c   :  { %2414 = vmatpush1.bf16.msra.mxu0 %v2996_v51 }
 0x25d   :  { %2446 = vmatpush1.bf16.msra.mxu1 %v3000_v52  ;;  %2416 = vmatprep.subr.bf16.mxu0 %v3002_v53 }
 0x25e   :  { %2448 = vmatprep.subr.bf16.mxu1 %v3005_v57 }
 0x260   :  { %2418 = vmatpush1.bf16.msra.mxu0 %v3008_v63 }
 0x261   :  { %2450 = vmatpush1.bf16.msra.mxu1 %v3012_v1  ;;  %2420 = vmatprep.subr.bf16.mxu0 %v3014_v2 }
 0x262   :  { %2452 = vmatprep.subr.bf16.mxu1 %v3017_v7 }
 0x264   :  { %2422 = vmatpush1.bf16.msra.mxu0 %v3020_v16 }
 0x265   :  { %2454 = vmatpush1.bf16.msra.mxu1 %v3024_v19  ;;  %2424 = vmatprep.subr.bf16.mxu0 %v3026_v20 }
 0x266   :  { %2456 = vmatprep.subr.bf16.mxu1 %v3029_v25 }
 0x268   :  { %2426 = vmatpush1.bf16.msra.mxu0 %v3032_v34 }
 0x269   :  { %2458 = vmatpush1.bf16.msra.mxu1 %v3036_v36  ;;  %2428 = vmatprep.subr.bf16.mxu0 %v3038_v37 }
 0x26a   :  { %2460 = vmatprep.subr.bf16.mxu1 %v3041_v42 }
 0x26c   :  { %2430 = vmatpush1.bf16.msra.mxu0 %v3044_v46 }
 0x26d   :  { %2462 = vmatpush1.bf16.msra.mxu1 %v3048_v47  ;;  %2464 = vmatprep.subr.bf16.mxu0 %v2957_v4 }
 0x26e   :  { %2496 = vmatprep.subr.bf16.mxu1 %v2959_v8 }
 0x2c1   :  { %v579_v29 = vpop.permute.xlu0 %578 }
 0x2c2   :  { %582 = vst.msk [vmem:[#allocation9] sm:$0x3] %vm581_vm1, %v579_v29 }
 0x322   :  { %v651_v41 = vpop.f32.mrb[4].mxu0 }
 0x323   :  { %v722_v55 = vpop.f32.mrb[4].mxu1  ;;  %v653_v48 = vpop.f32.mrb[5].mxu0 }
 0x324   :  { %v731_v56 = vcombine.low %v651_v41, %v653_v48  ;;  %v724_v58 = vpop.f32.mrb[5].mxu1 }
 0x325   :  { %v732_v60 = vcombine.low %v722_v55, %v724_v58 }
 0x326   :  { %v739_v61 = vrot.slane %v731_v56, %v3093_v59 }
 0x327   :  { %v746_v62 = vrot.slane %v732_v60, %v3093_v59  ;;  %v813_v60 = vld [vmem:[#allocation4 + $0x18] sm:$0xff] }
 0x329   :  { %v747_v5 = vcombine.low %v739_v61, %v746_v62 }
 0x32b   :  { %v749_v6 = vadd.f32 %v747_v5, %v584_v3 }
 0x32d   :  { %2802 = vtanh.f32 %v749_v6 }
 0x337   :  { %v2803_v10 = vpop.eup %2802 }
 0x338   :  { %v751_v11 = vmul.f32 0.5, %v2803_v10  ;;  %v754_v12 = vcombine.high %v2803_v10, %v2803_v10 }
 0x33a   :  { %v752_v14 = vadd.f32 0.5, %v751_v11  ;;  %v768_v21 = vrot.slane %v754_v12, %v3093_v59 }
 0x33c   :  { %v783_v15 = vrot.slane %v752_v14, %v3093_v59  ;;  %v776_v32 = vcombine.high %v752_v14, %v752_v14 }
 0x33e   :  { %v791_v23 = vcombine.high %v783_v15, %v783_v15  ;;  %v802_v28 = vmul.f32 %v783_v15, %v768_v21  ;;  %v790_v33 = vrot.slane %v776_v32, %v3093_v59 }
 0x340   :  { %v801_v24 = vmul.f32 %v791_v23, %v3149_v38  ;;  %v792_v43 = vcombine.high %v790_v33, %v790_v33 }
 0x342   :  { %v3194_v30 = vadd.f32 %v802_v28, %v801_v24 }
 0x344   :  { %2804 = vtanh.f32 %v3194_v30 }
 0x34e   :  { %v2805_v45 = vpop.eup %2804 }
 0x34f   :  { %v805_v49 = vmul.f32 %v2805_v45, %v792_v43 }
 0x351   :  { %807 = vrot.lane.b32.xlu0 %v805_v49, %s2910_s1  ;;  %879 = vmatmul.mubr.f32.vlgmr.msra.gmra.mrb[6].mxu0 %v805_v49 }
 0x352   :  { %950 = vmatmul.mubr.f32.vlgmr.msra.gmra.mrb[6].mxu1 %v805_v49  ;;  %2466 = vmatpush1.bf16.msra.mxu0 %v2961_v9 }
 0x353   :  { %2498 = vmatpush1.bf16.msra.mxu1 %v2964_v13  ;;  %2468 = vmatprep.subr.bf16.mxu0 %v2968_v17 }
 0x354   :  { %2500 = vmatprep.subr.bf16.mxu1 %v2970_v18  ;;  %1107 = vmatprep.mubr.f32.mxu0 %v2908_v0 }
 0x355   :  { %1178 = vmatprep.mubr.f32.mxu1 %v2908_v0 }
 0x356   :  { %2470 = vmatpush1.bf16.msra.mxu0 %v2973_v22 }
 0x357   :  { %2502 = vmatpush1.bf16.msra.mxu1 %v2977_v26  ;;  %2472 = vmatprep.subr.bf16.mxu0 %v2979_v27 }
 0x358   :  { %2504 = vmatprep.subr.bf16.mxu1 %v2981_v31 }
 0x35a   :  { %2474 = vmatpush1.bf16.msra.mxu0 %v2984_v35 }
 0x35b   :  { %2506 = vmatpush1.bf16.msra.mxu1 %v2988_v39  ;;  %2476 = vmatprep.subr.bf16.mxu0 %v2990_v40 }
 0x35c   :  { %2508 = vmatprep.subr.bf16.mxu1 %v2993_v44 }
 0x35e   :  { %2478 = vmatpush1.bf16.msra.mxu0 %v2996_v51 }
 0x35f   :  { %2510 = vmatpush1.bf16.msra.mxu1 %v3000_v52  ;;  %2480 = vmatprep.subr.bf16.mxu0 %v3002_v53 }
 0x360   :  { %2512 = vmatprep.subr.bf16.mxu1 %v3005_v57 }
 0x362   :  { %2482 = vmatpush1.bf16.msra.mxu0 %v3008_v63 }
 0x363   :  { %2514 = vmatpush1.bf16.msra.mxu1 %v3012_v1  ;;  %2484 = vmatprep.subr.bf16.mxu0 %v3014_v2 }
 0x364   :  { %2516 = vmatprep.subr.bf16.mxu1 %v3017_v7 }
 0x366   :  { %2486 = vmatpush1.bf16.msra.mxu0 %v3020_v16 }
 0x367   :  { %2518 = vmatpush1.bf16.msra.mxu1 %v3024_v19  ;;  %2488 = vmatprep.subr.bf16.mxu0 %v3026_v20 }
 0x368   :  { %2520 = vmatprep.subr.bf16.mxu1 %v3029_v25 }
 0x36a   :  { %2490 = vmatpush1.bf16.msra.mxu0 %v3032_v34 }
 0x36b   :  { %2522 = vmatpush1.bf16.msra.mxu1 %v3036_v36  ;;  %2492 = vmatprep.subr.bf16.mxu0 %v3038_v37 }
 0x36c   :  { %2524 = vmatprep.subr.bf16.mxu1 %v3041_v42 }
 0x36e   :  { %2494 = vmatpush1.bf16.msra.mxu0 %v3044_v46 }
 0x36f   :  { %2526 = vmatpush1.bf16.msra.mxu1 %v3048_v47  ;;  %2528 = vmatprep.subr.bf16.mxu0 %v2957_v4 }
 0x370   :  { %2560 = vmatprep.subr.bf16.mxu1 %v2959_v8 }
 0x3c3   :  { %v808_v38 = vpop.permute.xlu0 %807 }
 0x3c4   :  { %811 = vst.msk [vmem:[#allocation9 + $0x2] sm:$0x3] %vm581_vm1, %v808_v38 }
 0x424   :  { %v880_v50 = vpop.f32.mrb[6].mxu0 }
 0x425   :  { %v951_v54 = vpop.f32.mrb[6].mxu1  ;;  %v882_v29 = vpop.f32.mrb[7].mxu0 }
 0x426   :  { %v960_v41 = vcombine.low %v880_v50, %v882_v29  ;;  %v953_v55 = vpop.f32.mrb[7].mxu1 }
 0x427   :  { %v961_v48 = vcombine.low %v951_v54, %v953_v55 }
 0x428   :  { %v968_v56 = vrot.slane %v960_v41, %v3093_v59 }
 0x429   :  { %v975_v58 = vrot.slane %v961_v48, %v3093_v59  ;;  %v1042_v48 = vld [vmem:[#allocation4 + $0x20] sm:$0xff] }
 0x42b   :  { %v976_v61 = vcombine.low %v968_v56, %v975_v58 }
 0x42d   :  { %v978_v62 = vadd.f32 %v976_v61, %v813_v60 }
 0x42f   :  { %2806 = vtanh.f32 %v978_v62 }
 0x439   :  { %v2807_v3 = vpop.eup %2806 }
 0x43a   :  { %v980_v5 = vmul.f32 0.5, %v2807_v3  ;;  %v983_v6 = vcombine.high %v2807_v3, %v2807_v3 }
 0x43c   :  { %v981_v10 = vadd.f32 0.5, %v980_v5  ;;  %v997_v12 = vrot.slane %v983_v6, %v3093_v59 }
 0x43e   :  { %v1012_v11 = vrot.slane %v981_v10, %v3093_v59  ;;  %v1005_v24 = vcombine.high %v981_v10, %v981_v10 }
 0x440   :  { %v1020_v14 = vcombine.high %v1012_v11, %v1012_v11  ;;  %v1031_v21 = vmul.f32 %v1012_v11, %v997_v12  ;;  %v1019_v28 = vrot.slane %v1005_v24, %v3093_v59 }
 0x442   :  { %v1030_v15 = vmul.f32 %v1020_v14, %v3194_v30  ;;  %v1021_v32 = vcombine.high %v1019_v28, %v1019_v28 }
 0x444   :  { %v3239_v23 = vadd.f32 %v1031_v21, %v1030_v15 }
 0x446   :  { %2808 = vtanh.f32 %v3239_v23 }
 0x450   :  { %v2809_v33 = vpop.eup %2808 }
 0x451   :  { %v1034_v43 = vmul.f32 %v2809_v33, %v1021_v32 }
 0x453   :  { %1036 = vrot.lane.b32.xlu1 %v1034_v43, %s2910_s1  ;;  %1108 = vmatmul.mubr.f32.vlgmr.msra.gmra.mrb[8].mxu0 %v1034_v43 }
 0x454   :  { %1179 = vmatmul.mubr.f32.vlgmr.msra.gmra.mrb[8].mxu1 %v1034_v43  ;;  %2530 = vmatpush1.bf16.msra.mxu0 %v2961_v9 }
 0x455   :  { %2562 = vmatpush1.bf16.msra.mxu1 %v2964_v13  ;;  %2532 = vmatprep.subr.bf16.mxu0 %v2968_v17 }
 0x456   :  { %2564 = vmatprep.subr.bf16.mxu1 %v2970_v18  ;;  %1336 = vmatprep.mubr.f32.mxu0 %v2908_v0 }
 0x457   :  { %1407 = vmatprep.mubr.f32.mxu1 %v2908_v0 }
 0x458   :  { %2534 = vmatpush1.bf16.msra.mxu0 %v2973_v22 }
 0x459   :  { %2566 = vmatpush1.bf16.msra.mxu1 %v2977_v26  ;;  %2536 = vmatprep.subr.bf16.mxu0 %v2979_v27 }
 0x45a   :  { %2568 = vmatprep.subr.bf16.mxu1 %v2981_v31 }
 0x45c   :  { %2538 = vmatpush1.bf16.msra.mxu0 %v2984_v35 }
 0x45d   :  { %2570 = vmatpush1.bf16.msra.mxu1 %v2988_v39  ;;  %2540 = vmatprep.subr.bf16.mxu0 %v2990_v40 }
 0x45e   :  { %2572 = vmatprep.subr.bf16.mxu1 %v2993_v44 }
 0x460   :  { %2542 = vmatpush1.bf16.msra.mxu0 %v2996_v51 }
 0x461   :  { %2574 = vmatpush1.bf16.msra.mxu1 %v3000_v52  ;;  %2544 = vmatprep.subr.bf16.mxu0 %v3002_v53 }
 0x462   :  { %2576 = vmatprep.subr.bf16.mxu1 %v3005_v57 }
 0x464   :  { %2546 = vmatpush1.bf16.msra.mxu0 %v3008_v63 }
 0x465   :  { %2578 = vmatpush1.bf16.msra.mxu1 %v3012_v1  ;;  %2548 = vmatprep.subr.bf16.mxu0 %v3014_v2 }
 0x466   :  { %2580 = vmatprep.subr.bf16.mxu1 %v3017_v7 }
 0x468   :  { %2550 = vmatpush1.bf16.msra.mxu0 %v3020_v16 }
 0x469   :  { %2582 = vmatpush1.bf16.msra.mxu1 %v3024_v19  ;;  %2552 = vmatprep.subr.bf16.mxu0 %v3026_v20 }
 0x46a   :  { %2584 = vmatprep.subr.bf16.mxu1 %v3029_v25 }
 0x46c   :  { %2554 = vmatpush1.bf16.msra.mxu0 %v3032_v34 }
 0x46d   :  { %2586 = vmatpush1.bf16.msra.mxu1 %v3036_v36  ;;  %2556 = vmatprep.subr.bf16.mxu0 %v3038_v37 }
 0x46e   :  { %2588 = vmatprep.subr.bf16.mxu1 %v3041_v42 }
 0x470   :  { %2558 = vmatpush1.bf16.msra.mxu0 %v3044_v46 }
 0x471   :  { %2590 = vmatpush1.bf16.msra.mxu1 %v3048_v47  ;;  %2592 = vmatprep.subr.bf16.mxu0 %v2957_v4 }
 0x472   :  { %2624 = vmatprep.subr.bf16.mxu1 %v2959_v8 }
 0x4c5   :  { %v1037_v30 = vpop.permute.xlu1 %1036 }
 0x4c6   :  { %1040 = vst.msk [vmem:[#allocation9 + $0x4] sm:$0x3] %vm581_vm1, %v1037_v30 }
 0x526   :  { %v1109_v45 = vpop.f32.mrb[8].mxu0 }
 0x527   :  { %v1180_v49 = vpop.f32.mrb[8].mxu1  ;;  %v1111_v38 = vpop.f32.mrb[9].mxu0 }
 0x528   :  { %v1189_v50 = vcombine.low %v1109_v45, %v1111_v38  ;;  %v1182_v54 = vpop.f32.mrb[9].mxu1 }
 0x529   :  { %v1190_v29 = vcombine.low %v1180_v49, %v1182_v54 }
 0x52a   :  { %v1197_v41 = vrot.slane %v1189_v50, %v3093_v59 }
 0x52b   :  { %v1204_v55 = vrot.slane %v1190_v29, %v3093_v59  ;;  %v1271_v29 = vld [vmem:[#allocation4 + $0x28] sm:$0xff] }
 0x52d   :  { %v1205_v56 = vcombine.low %v1197_v41, %v1204_v55 }
 0x52f   :  { %v1207_v58 = vadd.f32 %v1205_v56, %v1042_v48 }
 0x531   :  { %2810 = vtanh.f32 %v1207_v58 }
 0x53b   :  { %v2811_v60 = vpop.eup %2810 }
 0x53c   :  { %v1209_v61 = vmul.f32 0.5, %v2811_v60  ;;  %v1212_v62 = vcombine.high %v2811_v60, %v2811_v60 }
 0x53e   :  { %v1210_v3 = vadd.f32 0.5, %v1209_v61  ;;  %v1226_v6 = vrot.slane %v1212_v62, %v3093_v59 }
 0x540   :  { %v1241_v5 = vrot.slane %v1210_v3, %v3093_v59  ;;  %v1234_v15 = vcombine.high %v1210_v3, %v1210_v3 }
 0x542   :  { %v1249_v10 = vcombine.high %v1241_v5, %v1241_v5  ;;  %v1260_v12 = vmul.f32 %v1241_v5, %v1226_v6  ;;  %v1248_v21 = vrot.slane %v1234_v15, %v3093_v59 }
 0x544   :  { %v1259_v11 = vmul.f32 %v1249_v10, %v3239_v23  ;;  %v1250_v24 = vcombine.high %v1248_v21, %v1248_v21 }
 0x546   :  { %v3284_v14 = vadd.f32 %v1260_v12, %v1259_v11 }
 0x548   :  { %2812 = vtanh.f32 %v3284_v14 }
 0x552   :  { %v2813_v28 = vpop.eup %2812 }
 0x553   :  { %v1263_v32 = vmul.f32 %v2813_v28, %v1250_v24 }
 0x555   :  { %1265 = vrot.lane.b32.xlu1 %v1263_v32, %s2910_s1  ;;  %1337 = vmatmul.mubr.f32.vlgmr.msra.gmra.mrb[10].mxu0 %v1263_v32 }
 0x556   :  { %1408 = vmatmul.mubr.f32.vlgmr.msra.gmra.mrb[10].mxu1 %v1263_v32  ;;  %2594 = vmatpush1.bf16.msra.mxu0 %v2961_v9 }
 0x557   :  { %2626 = vmatpush1.bf16.msra.mxu1 %v2964_v13  ;;  %2596 = vmatprep.subr.bf16.mxu0 %v2968_v17 }
 0x558   :  { %2628 = vmatprep.subr.bf16.mxu1 %v2970_v18  ;;  %1565 = vmatprep.mubr.f32.mxu0 %v2908_v0 }
 0x559   :  { %1636 = vmatprep.mubr.f32.mxu1 %v2908_v0 }
 0x55a   :  { %2598 = vmatpush1.bf16.msra.mxu0 %v2973_v22 }
 0x55b   :  { %2630 = vmatpush1.bf16.msra.mxu1 %v2977_v26  ;;  %2600 = vmatprep.subr.bf16.mxu0 %v2979_v27 }
 0x55c   :  { %2632 = vmatprep.subr.bf16.mxu1 %v2981_v31 }
 0x55e   :  { %2602 = vmatpush1.bf16.msra.mxu0 %v2984_v35 }
 0x55f   :  { %2634 = vmatpush1.bf16.msra.mxu1 %v2988_v39  ;;  %2604 = vmatprep.subr.bf16.mxu0 %v2990_v40 }
 0x560   :  { %2636 = vmatprep.subr.bf16.mxu1 %v2993_v44 }
 0x562   :  { %2606 = vmatpush1.bf16.msra.mxu0 %v2996_v51 }
 0x563   :  { %2638 = vmatpush1.bf16.msra.mxu1 %v3000_v52  ;;  %2608 = vmatprep.subr.bf16.mxu0 %v3002_v53 }
 0x564   :  { %2640 = vmatprep.subr.bf16.mxu1 %v3005_v57 }
 0x566   :  { %2610 = vmatpush1.bf16.msra.mxu0 %v3008_v63 }
 0x567   :  { %2642 = vmatpush1.bf16.msra.mxu1 %v3012_v1  ;;  %2612 = vmatprep.subr.bf16.mxu0 %v3014_v2 }
 0x568   :  { %2644 = vmatprep.subr.bf16.mxu1 %v3017_v7 }
 0x56a   :  { %2614 = vmatpush1.bf16.msra.mxu0 %v3020_v16 }
 0x56b   :  { %2646 = vmatpush1.bf16.msra.mxu1 %v3024_v19  ;;  %2616 = vmatprep.subr.bf16.mxu0 %v3026_v20 }
 0x56c   :  { %2648 = vmatprep.subr.bf16.mxu1 %v3029_v25 }
 0x56e   :  { %2618 = vmatpush1.bf16.msra.mxu0 %v3032_v34 }
 0x56f   :  { %2650 = vmatpush1.bf16.msra.mxu1 %v3036_v36  ;;  %2620 = vmatprep.subr.bf16.mxu0 %v3038_v37 }
 0x570   :  { %2652 = vmatprep.subr.bf16.mxu1 %v3041_v42 }
 0x572   :  { %2622 = vmatpush1.bf16.msra.mxu0 %v3044_v46 }
 0x573   :  { %2654 = vmatpush1.bf16.msra.mxu1 %v3048_v47  ;;  %2656 = vmatprep.subr.bf16.mxu0 %v2957_v4 }
 0x574   :  { %2688 = vmatprep.subr.bf16.mxu1 %v2959_v8 }
 0x5c7   :  { %v1266_v23 = vpop.permute.xlu1 %1265 }
 0x5c8   :  { %1269 = vst.msk [vmem:[#allocation9 + $0x6] sm:$0x3] %vm581_vm1, %v1266_v23 }
 0x628   :  { %v1338_v33 = vpop.f32.mrb[10].mxu0 }
 0x629   :  { %v1409_v43 = vpop.f32.mrb[10].mxu1  ;;  %v1340_v30 = vpop.f32.mrb[11].mxu0 }
 0x62a   :  { %v1418_v45 = vcombine.low %v1338_v33, %v1340_v30  ;;  %v1411_v49 = vpop.f32.mrb[11].mxu1 }
 0x62b   :  { %v1419_v38 = vcombine.low %v1409_v43, %v1411_v49 }
 0x62c   :  { %v1426_v50 = vrot.slane %v1418_v45, %v3093_v59 }
 0x62d   :  { %v1433_v54 = vrot.slane %v1419_v38, %v3093_v59  ;;  %v1500_v38 = vld [vmem:[#allocation4 + $0x30] sm:$0xff] }
 0x62f   :  { %v1434_v41 = vcombine.low %v1426_v50, %v1433_v54 }
 0x631   :  { %v1436_v55 = vadd.f32 %v1434_v41, %v1271_v29 }
 0x633   :  { %2814 = vtanh.f32 %v1436_v55 }
 0x63d   :  { %v2815_v48 = vpop.eup %2814 }
 0x63e   :  { %v1438_v56 = vmul.f32 0.5, %v2815_v48  ;;  %v1441_v58 = vcombine.high %v2815_v48, %v2815_v48 }
 0x640   :  { %v1439_v60 = vadd.f32 0.5, %v1438_v56  ;;  %v1455_v62 = vrot.slane %v1441_v58, %v3093_v59 }
 0x642   :  { %v1470_v61 = vrot.slane %v1439_v60, %v3093_v59  ;;  %v1463_v11 = vcombine.high %v1439_v60, %v1439_v60 }
 0x644   :  { %v1478_v3 = vcombine.high %v1470_v61, %v1470_v61  ;;  %v1489_v6 = vmul.f32 %v1470_v61, %v1455_v62  ;;  %v1477_v12 = vrot.slane %v1463_v11, %v3093_v59 }
 0x646   :  { %v1488_v5 = vmul.f32 %v1478_v3, %v3284_v14  ;;  %v1479_v15 = vcombine.high %v1477_v12, %v1477_v12 }
 0x648   :  { %v3329_v10 = vadd.f32 %v1489_v6, %v1488_v5 }
 0x64a   :  { %2816 = vtanh.f32 %v3329_v10 }
 0x654   :  { %v2817_v21 = vpop.eup %2816 }
 0x655   :  { %v1492_v24 = vmul.f32 %v2817_v21, %v1479_v15 }
 0x657   :  { %1494 = vrot.lane.b32.xlu0 %v1492_v24, %s2910_s1  ;;  %1566 = vmatmul.mubr.f32.vlgmr.msra.gmra.mrb[12].mxu0 %v1492_v24 }
 0x658   :  { %1637 = vmatmul.mubr.f32.vlgmr.msra.gmra.mrb[12].mxu1 %v1492_v24  ;;  %2658 = vmatpush1.bf16.msra.mxu0 %v2961_v9 }
 0x659   :  { %2690 = vmatpush1.bf16.msra.mxu1 %v2964_v13  ;;  %2660 = vmatprep.subr.bf16.mxu0 %v2968_v17 }
 0x65a   :  { %2692 = vmatprep.subr.bf16.mxu1 %v2970_v18  ;;  %1794 = vmatprep.mubr.f32.mxu0 %v2908_v0 }
 0x65b   :  { %1865 = vmatprep.mubr.f32.mxu1 %v2908_v0 }
 0x65c   :  { %2662 = vmatpush1.bf16.msra.mxu0 %v2973_v22 }
 0x65d   :  { %2694 = vmatpush1.bf16.msra.mxu1 %v2977_v26  ;;  %2664 = vmatprep.subr.bf16.mxu0 %v2979_v27 }
 0x65e   :  { %2696 = vmatprep.subr.bf16.mxu1 %v2981_v31 }
 0x660   :  { %2666 = vmatpush1.bf16.msra.mxu0 %v2984_v35 }
 0x661   :  { %2698 = vmatpush1.bf16.msra.mxu1 %v2988_v39  ;;  %2668 = vmatprep.subr.bf16.mxu0 %v2990_v40 }
 0x662   :  { %2700 = vmatprep.subr.bf16.mxu1 %v2993_v44 }
 0x664   :  { %2670 = vmatpush1.bf16.msra.mxu0 %v2996_v51 }
 0x665   :  { %2702 = vmatpush1.bf16.msra.mxu1 %v3000_v52  ;;  %2672 = vmatprep.subr.bf16.mxu0 %v3002_v53 }
 0x666   :  { %2704 = vmatprep.subr.bf16.mxu1 %v3005_v57 }
 0x668   :  { %2674 = vmatpush1.bf16.msra.mxu0 %v3008_v63 }
 0x669   :  { %2706 = vmatpush1.bf16.msra.mxu1 %v3012_v1  ;;  %2676 = vmatprep.subr.bf16.mxu0 %v3014_v2 }
 0x66a   :  { %2708 = vmatprep.subr.bf16.mxu1 %v3017_v7 }
 0x66c   :  { %2678 = vmatpush1.bf16.msra.mxu0 %v3020_v16 }
 0x66d   :  { %2710 = vmatpush1.bf16.msra.mxu1 %v3024_v19  ;;  %2680 = vmatprep.subr.bf16.mxu0 %v3026_v20 }
 0x66e   :  { %2712 = vmatprep.subr.bf16.mxu1 %v3029_v25 }
 0x670   :  { %2682 = vmatpush1.bf16.msra.mxu0 %v3032_v34 }
 0x671   :  { %2714 = vmatpush1.bf16.msra.mxu1 %v3036_v36  ;;  %2684 = vmatprep.subr.bf16.mxu0 %v3038_v37 }
 0x672   :  { %2716 = vmatprep.subr.bf16.mxu1 %v3041_v42 }
 0x674   :  { %2686 = vmatpush1.bf16.msra.mxu0 %v3044_v46 }
 0x675   :  { %2718 = vmatpush1.bf16.msra.mxu1 %v3048_v47  ;;  %2720 = vmatprep.subr.bf16.mxu0 %v2957_v4 }
 0x676   :  { %2752 = vmatprep.subr.bf16.mxu1 %v2959_v8 }
 0x6c9   :  { %v1495_v14 = vpop.permute.xlu0 %1494 }
 0x6ca   :  { %1498 = vst.msk [vmem:[#allocation9 + $0x8] sm:$0x3] %vm581_vm1, %v1495_v14  ;;  %v1957_v14 = vld [vmem:[#allocation4] sm:$0xff] }
 0x72a   :  { %v1567_v28 = vpop.f32.mrb[12].mxu0 }
 0x72b   :  { %v1638_v32 = vpop.f32.mrb[12].mxu1  ;;  %v1569_v23 = vpop.f32.mrb[13].mxu0 }
 0x72c   :  { %v1647_v33 = vcombine.low %v1567_v28, %v1569_v23  ;;  %v1640_v43 = vpop.f32.mrb[13].mxu1 }
 0x72d   :  { %v1648_v30 = vcombine.low %v1638_v32, %v1640_v43 }
 0x72e   :  { %v1655_v45 = vrot.slane %v1647_v33, %v3093_v59 }
 0x72f   :  { %v1662_v49 = vrot.slane %v1648_v30, %v3093_v59 }
 0x731   :  { %v1663_v50 = vcombine.low %v1655_v45, %v1662_v49 }
 0x733   :  { %v1665_v54 = vadd.f32 %v1663_v50, %v1500_v38 }
 0x735   :  { %2818 = vtanh.f32 %v1665_v54 }
 0x73f   :  { %v2819_v4 = vpop.eup %2818 }
 0x740   :  { %v1667_v29 = vmul.f32 0.5, %v2819_v4  ;;  %v1670_v8 = vcombine.high %v2819_v4, %v2819_v4 }
 0x742   :  { %v1668_v41 = vadd.f32 0.5, %v1667_v29  ;;  %v1684_v48 = vrot.slane %v1670_v8, %v3093_v59 }
 0x744   :  { %v1699_v55 = vrot.slane %v1668_v41, %v3093_v59  ;;  %v1692_v62 = vcombine.high %v1668_v41, %v1668_v41 }
 0x746   :  { %v1707_v56 = vcombine.high %v1699_v55, %v1699_v55  ;;  %v1718_v60 = vmul.f32 %v1699_v55, %v1684_v48  ;;  %v1706_v3 = vrot.slane %v1692_v62, %v3093_v59 }
 0x748   :  { %v1717_v58 = vmul.f32 %v1707_v56, %v3329_v10  ;;  %v1708_v5 = vcombine.high %v1706_v3, %v1706_v3 }
 0x74a   :  { %v3374_v61 = vadd.f32 %v1718_v60, %v1717_v58 }
 0x74c   :  { %2820 = vtanh.f32 %v3374_v61 }
 0x756   :  { %v2821_v6 = vpop.eup %2820 }
 0x757   :  { %v1721_v11 = vmul.f32 %v2821_v6, %v1708_v5 }
 0x759   :  { %1723 = vrot.lane.b32.xlu1 %v1721_v11, %s2910_s1  ;;  %1795 = vmatmul.mubr.f32.vlgmr.msra.gmra.mrb[14].mxu0 %v1721_v11 }
 0x75a   :  { %1866 = vmatmul.mubr.f32.vlgmr.msra.gmra.mrb[14].mxu1 %v1721_v11  ;;  %2722 = vmatpush1.bf16.msra.mxu0 %v2961_v9 }
 0x75b   :  { %2754 = vmatpush1.bf16.msra.mxu1 %v2964_v13  ;;  %2724 = vmatprep.subr.bf16.mxu0 %v2968_v17 }
 0x75c   :  { %2756 = vmatprep.subr.bf16.mxu1 %v2970_v18  ;;  %2022 = vmatprep.mubr.f32.mxu0 %v2908_v0 }
 0x75d   :  { %2093 = vmatprep.mubr.f32.mxu1 %v2908_v0 }
 0x75e   :  { %2726 = vmatpush1.bf16.msra.mxu0 %v2973_v22 }
 0x75f   :  { %2758 = vmatpush1.bf16.msra.mxu1 %v2977_v26  ;;  %2728 = vmatprep.subr.bf16.mxu0 %v2979_v27 }
 0x760   :  { %2760 = vmatprep.subr.bf16.mxu1 %v2981_v31 }
 0x762   :  { %2730 = vmatpush1.bf16.msra.mxu0 %v2984_v35  ;;  %v1729_v35 = vld [vmem:[#allocation4 + $0x38] sm:$0xff] }
 0x763   :  { %2762 = vmatpush1.bf16.msra.mxu1 %v2988_v39  ;;  %2732 = vmatprep.subr.bf16.mxu0 %v2990_v40 }
 0x764   :  { %2764 = vmatprep.subr.bf16.mxu1 %v2993_v44 }
 0x766   :  { %2734 = vmatpush1.bf16.msra.mxu0 %v2996_v51 }
 0x767   :  { %2766 = vmatpush1.bf16.msra.mxu1 %v3000_v52  ;;  %2736 = vmatprep.subr.bf16.mxu0 %v3002_v53 }
 0x768   :  { %2768 = vmatprep.subr.bf16.mxu1 %v3005_v57 }
 0x76a   :  { %2738 = vmatpush1.bf16.msra.mxu0 %v3008_v63 }
 0x76b   :  { %2770 = vmatpush1.bf16.msra.mxu1 %v3012_v1  ;;  %2740 = vmatprep.subr.bf16.mxu0 %v3014_v2 }
 0x76c   :  { %2772 = vmatprep.subr.bf16.mxu1 %v3017_v7 }
 0x76e   :  { %2742 = vmatpush1.bf16.msra.mxu0 %v3020_v16 }
 0x76f   :  { %2774 = vmatpush1.bf16.msra.mxu1 %v3024_v19  ;;  %2744 = vmatprep.subr.bf16.mxu0 %v3026_v20 }
 0x770   :  { %2776 = vmatprep.subr.bf16.mxu1 %v3029_v25 }
 0x772   :  { %2746 = vmatpush1.bf16.msra.mxu0 %v3032_v34 }
 0x773   :  { %2778 = vmatpush1.bf16.msra.mxu1 %v3036_v36  ;;  %2748 = vmatprep.subr.bf16.mxu0 %v3038_v37 }
 0x774   :  { %2780 = vmatprep.subr.bf16.mxu1 %v3041_v42 }
 0x776   :  { %2750 = vmatpush1.bf16.msra.mxu0 %v3044_v46 }
 0x777   :  { %2782 = vmatpush1.bf16.msra.mxu1 %v3048_v47 }
 0x7cb   :  { %v1724_v0 = vpop.permute.xlu1 %1723 }
 0x7cc   :  { %1727 = vst.msk [vmem:[#allocation9 + $0xa] sm:$0x3] %vm581_vm1, %v1724_v0 }
 0x82c   :  { %v1796_v9 = vpop.f32.mrb[14].mxu0 }
 0x82d   :  { %v1867_v13 = vpop.f32.mrb[14].mxu1  ;;  %v1798_v17 = vpop.f32.mrb[15].mxu0 }
 0x82e   :  { %v1876_v18 = vcombine.low %v1796_v9, %v1798_v17  ;;  %v1869_v22 = vpop.f32.mrb[15].mxu1 }
 0x82f   :  { %v1877_v26 = vcombine.low %v1867_v13, %v1869_v22 }
 0x830   :  { %v1884_v27 = vrot.slane %v1876_v18, %v3093_v59 }
 0x831   :  { %v1891_v31 = vrot.slane %v1877_v26, %v3093_v59 }
 0x833   :  { %v1892_v39 = vcombine.low %v1884_v27, %v1891_v31 }
 0x835   :  { %v1894_v40 = vadd.f32 %v1892_v39, %v1729_v35 }
 0x837   :  { %2822 = vtanh.f32 %v1894_v40 }
 0x841   :  { %v2823_v44 = vpop.eup %2822 }
 0x842   :  { %v1896_v51 = vmul.f32 0.5, %v2823_v44  ;;  %v1899_v52 = vcombine.high %v2823_v44, %v2823_v44 }
 0x844   :  { %v1897_v53 = vadd.f32 0.5, %v1896_v51  ;;  %v1913_v63 = vrot.slane %v1899_v52, %v3093_v59 }
 0x846   :  { %v1928_v57 = vrot.slane %v1897_v53, %v3093_v59  ;;  %v1921_v19 = vcombine.high %v1897_v53, %v1897_v53 }
 0x848   :  { %v1936_v1 = vcombine.high %v1928_v57, %v1928_v57  ;;  %v1947_v7 = vmul.f32 %v1928_v57, %v1913_v63  ;;  %v1935_v20 = vrot.slane %v1921_v19, %v3093_v59 }
 0x84a   :  { %v1946_v2 = vmul.f32 %v1936_v1, %v3374_v61  ;;  %v1937_v25 = vcombine.high %v1935_v20, %v1935_v20 }
 0x84c   :  { %v1948_v16 = vadd.f32 %v1947_v7, %v1946_v2 }
 0x84e   :  { %2824 = vtanh.f32 %v1948_v16 }
 0x858   :  { %v2825_v34 = vpop.eup %2824 }
 0x859   :  { %v1950_v36 = vmul.f32 %v2825_v34, %v1937_v25 }
 0x85b   :  { %1952 = vrot.lane.b32.xlu0 %v1950_v36, %s2910_s1  ;;  %2023 = vmatmul.mubr.f32.vlgmr.msra.gmra.mrb[16].mxu0 %v1950_v36 }
 0x85c   :  { %2094 = vmatmul.mubr.f32.vlgmr.msra.gmra.mrb[16].mxu1 %v1950_v36 }
 0x8cd   :  { %v1953_v37 = vpop.permute.xlu0 %1952 }
 0x8ce   :  { %1956 = vst.msk [vmem:[#allocation9 + $0xc] sm:$0x3] %vm581_vm1, %v1953_v37 }
 0x92e   :  { %v2024_v42 = vpop.f32.mrb[16].mxu0 }
 0x92f   :  { %v2095_v46 = vpop.f32.mrb[16].mxu1  ;;  %v2026_v47 = vpop.f32.mrb[17].mxu0 }
 0x930   :  { %v2104_v10 = vcombine.low %v2024_v42, %v2026_v47  ;;  %v2097_v12 = vpop.f32.mrb[17].mxu1 }
 0x931   :  { %v2105_v15 = vcombine.low %v2095_v46, %v2097_v12 }
 0x932   :  { %v2112_v21 = vrot.slane %v2104_v10, %v3093_v59 }
 0x933   :  { %v2119_v24 = vrot.slane %v2105_v15, %v3093_v59 }
 0x935   :  { %v2120_v28 = vcombine.low %v2112_v21, %v2119_v24 }
 0x937   :  { %v2122_v32 = vadd.f32 %v2120_v28, %v1957_v14 }
 0x939   :  { %2826 = vtanh.f32 %v2122_v32 }
 0x943   :  { %v2827_v23 = vpop.eup %2826 }
 0x944   :  { %v2124_v33 = vmul.f32 0.5, %v2827_v23  ;;  %v2127_v43 = vcombine.high %v2827_v23, %v2827_v23 }
 0x946   :  { %v2125_v30 = vadd.f32 0.5, %v2124_v33  ;;  %v2141_v49 = vrot.slane %v2127_v43, %v3093_v59 }
 0x948   :  { %v2156_v45 = vrot.slane %v2125_v30, %v3093_v59  ;;  %v2149_v8 = vcombine.high %v2125_v30, %v2125_v30 }
 0x94a   :  { %v2164_v38 = vcombine.high %v2156_v45, %v2156_v45  ;;  %v2175_v54 = vmul.f32 %v2156_v45, %v2141_v49  ;;  %v2163_v41 = vrot.slane %v2149_v8, %v3093_v59 }
 0x94c   :  { %v2174_v50 = vmul.f32 %v2164_v38, %v1948_v16  ;;  %v2165_v55 = vcombine.high %v2163_v41, %v2163_v41 }
 0x94e   :  { %v2176_v4 = vadd.f32 %v2175_v54, %v2174_v50 }
 0x950   :  { %2828 = vtanh.f32 %v2176_v4  ;;  %v2187_v29 = vsel %vm351_vm0, %v1948_v16, %v2176_v4 }
 0x951   :  { %2188 = vst [vmem:[#allocation3] sm:$0x3] %v2187_v29 }
 0x95a   :  { %v2829_v48 = vpop.eup %2828 }
 0x95b   :  { %v2178_v56 = vmul.f32 %v2829_v48, %v2165_v55 }
 0x95d   :  { %2180 = vrot.lane.b32.xlu1 %v2178_v56, %s2910_s1  ;;  %v2185_v58 = vsel %vm351_vm0, %v1950_v36, %v2178_v56 }
 0x95e   :  { %2186 = vst [vmem:[#allocation2] sm:$0x3] %v2185_v58 }
 0x9cf   :  { %v2181_v60 = vpop.permute.xlu1 %2180 }
 0x9d0   :  { %2184 = vst.msk [vmem:[#allocation9 + $0xe] sm:$0x3] %vm581_vm1, %v2181_v60 }
 0x9d1   :  { %2885 = shalt.err (!%p2882_p6)
}
 0x9d2   :  { %s2886_s13 = scalar_lea.hbm %s3445_s2, 256 }
 0x9d3   :  { %p2887_p7 = scmp.ne.s32.totalorder %s3445_s2, %s2886_s13  ;;  %p2890_p8 = scmp.lt.u32.totalorder %s2886_s13, %s3445_s2 }
 0x9d5   :  { %p2892_p9 = pnand %p2890_p8, %p2887_p7 }
 0x9d7   :  { %2895 = shalt.err (!%p2892_p9)
}
 0x9d8   :  { %s2912_s18 = smov 2  }
 0x9d9   :  { %2200 = dma.vmem_to_hbm [thread:$0]  %s2195_s9, 256, %s3445_s2, [#allocation6], %s2907_s5, %s2907_s5, %s2912_s18  }
 0x9da   :  { %2900 = dma.done.wait [#allocation6], 256  }
 0x9db   :  { %2901 = vsyncadd [#allocation6], 4294967040 }
 0x9dc   :  { %2204 = vsyncpa [#allocation5], 1 }
 0x9dd   :  { %2205 = vsyncpa [#allocation8], 1 }
 0x9de   :  { %2206 = vsyncpa [#allocation6], 1 }

</bundles_post_ra>
